<compile_context>
chip_gen: v7x
topology: tpu7x:2x2x1
jax: 0.10.0
libtpu: 0.0.40
codegen_flags: <defaults>
</compile_context>

<pallas_src>
import functools

import jax
import jax.numpy as jnp
from jax import lax
from jax.experimental import pallas as pl
from jax.experimental.pallas import tpu as pltpu


# ---------------------------------------------------------------------------
# Small helpers
# ---------------------------------------------------------------------------
def _round_up(x, m):
    return ((x + m - 1) // m) * m


def _erf_poly(x):
    # Abramowitz & Stegun 7.1.26 (max abs err ~1.5e-7); uses only exp/mul/div.
    a1, a2, a3, a4, a5 = 0.254829592, -0.284496736, 1.421413741, -1.453152027, 1.061405429
    p = 0.3275911
    ax = jnp.abs(x)
    t = 1.0 / (1.0 + p * ax)
    poly = t * (a1 + t * (a2 + t * (a3 + t * (a4 + t * a5))))
    y = 1.0 - poly * jnp.exp(-ax * ax)
    return jnp.where(x >= 0, y, -y)


def _gelu_exact(x):
    return 0.5 * x * (1.0 + _erf_poly(x * 0.7071067811865476))


def _layernorm_f32(x, g, b, eps):
    mu = jnp.mean(x, axis=-1, keepdims=True)
    xc = x - mu
    var = jnp.mean(xc * xc, axis=-1, keepdims=True)
    return xc * lax.rsqrt(var + eps) * g + b


# ---------------------------------------------------------------------------
# Fused residual-block kernel: one grid step = one (tm, D) tile of the stream
# ---------------------------------------------------------------------------
def _fused_block_kernel(h_ref, wq_ref, kv_ref, wo_ref, w1_ref, b1_ref,
                        w2_ref, b2_ref, lag_ref, lab_ref, lfg_ref, lfb_ref,
                        o_ref, *, heads, dim_head, eps):
    h = h_ref[...].astype(jnp.float32)                              # (tm, D) residual stream

    # ---- PreNorm(Attention): attn(LN(h), ctx=precomputed kv), wo fused, + residual
    xq = _layernorm_f32(h, lag_ref[...].astype(jnp.float32),
                        lab_ref[...].astype(jnp.float32), eps)
    q = jnp.dot(xq, wq_ref[...].astype(jnp.float32),
                preferred_element_type=jnp.float32)                 # (tm, inner); scale pre-folded
    kv = kv_ref[...].astype(jnp.float32)                            # (Nk, 2*inner); param-time precompute
    wo = wo_ref[...].astype(jnp.float32)                            # (inner, D)
    inner = heads * dim_head

    attn = jnp.zeros(h.shape, jnp.float32)
    for hh in range(heads):                                         # static unroll; heads is tiny
        lo = hh * dim_head
        qh = q[:, lo:lo + dim_head]
        kh = kv[:, lo:lo + dim_head]
        vh = kv[:, inner + lo:inner + lo + dim_head]
        # q @ k^T without materializing k.T (trans-B contraction on last dims).
        s = lax.dot_general(qh, kh, (((1,), (1,)), ((), ())),
                            preferred_element_type=jnp.float32)     # (tm, Nk)
        s = s - jnp.max(s, axis=-1, keepdims=True)
        p = jnp.exp(s)
        p = p * pl.reciprocal(jnp.sum(p, axis=-1, keepdims=True), approx=True)
        oh = jnp.dot(p, vh, preferred_element_type=jnp.float32)     # (tm, dim_head)
        # Per-head out-projection accumulated straight into the 128-wide stream:
        attn = attn + jnp.dot(oh, wo[lo:lo + dim_head, :],
                              preferred_element_type=jnp.float32)
    h = h + attn

    # ---- PreNorm(FeedForward): ff2(GEGLU(ff1(LN(h)))) + residual, all in VMEM
    xf = _layernorm_f32(h, lfg_ref[...].astype(jnp.float32),
                        lfb_ref[...].astype(jnp.float32), eps)
    h1 = jnp.dot(xf, w1_ref[...].astype(jnp.float32),
                 preferred_element_type=jnp.float32) + b1_ref[...].astype(jnp.float32)
    F = w2_ref.shape[0]
    g = h1[:, :F] * _gelu_exact(h1[:, F:])                          # GEGLU, exact-erf GELU
    ff = jnp.dot(g, w2_ref[...].astype(jnp.float32),
                 preferred_element_type=jnp.float32) + b2_ref[...].astype(jnp.float32)

    # Single lane-dense (tm, 128) store of the updated residual stream.
    o_ref[...] = (h + ff).astype(o_ref.dtype)


def fused_latent_block(hiddens2d, p, *, heads, dim_head, eps=1e-5, row_tile=512):
    """hiddens2d: (M, D) residual stream.  Returns the post-block stream (M, D)."""
    M, D = hiddens2d.shape
    inner = heads * dim_head
    Nk = p["kv"].shape[0]
    F = p["w_ff2_t"].shape[0]
    F2 = p["w_ff1_t"].shape[1]

    # Row tile: large (HBM-roofline friendly), never a full-dim fallback; rows are
    # padded so the grid divides exactly (padded rows are finite and sliced away).
    tm = min(row_tile, _round_up(M, 8))
    M_pad = _round_up(M, tm)
    x = hiddens2d
    if M_pad != M:
        x = jnp.pad(x, ((0, M_pad - M), (0, 0)))

    def const(shape):
        return pl.BlockSpec(shape, lambda i: (0, 0))     # resident: fetched once

    out = pl.pallas_call(
        functools.partial(_fused_block_kernel, heads=heads, dim_head=dim_head, eps=eps),
        out_shape=jax.ShapeDtypeStruct((M_pad, D), hiddens2d.dtype),
        grid=(M_pad // tm,),
        in_specs=[
            pl.BlockSpec((tm, D), lambda i: (i, 0)),      # residual-stream tile
            const((D, inner)),                            # wq_t (attention scale folded in)
            const((Nk, 2 * inner)),                       # kv = LN(latents) @ wkv_t (precomputed)
            const((inner, D)),                            # wo_t
            const((D, F2)),                               # w_ff1_t
            const((1, F2)),                               # b_ff1
            const((F, D)),                                # w_ff2_t
            const((1, D)),                                # b_ff2
            const((1, D)), const((1, D)),                 # ln_attn gamma / beta
            const((1, D)), const((1, D)),                 # ln_ff gamma / beta
        ],
        out_specs=pl.BlockSpec((tm, D), lambda i: (i, 0)),
        compiler_params=pltpu.CompilerParams(dimension_semantics=("parallel",)),
    )(x, p["wq_t"], p["kv"], p["wo_t"], p["w_ff1_t"], p["b_ff1"],
      p["w_ff2_t"], p["b_ff2"], p["ln_attn_g"], p["ln_attn_b"],
      p["ln_ff_g"], p["ln_ff_b"])

    return out[:M] if M_pad != M else out


# ---------------------------------------------------------------------------
# Parameter preparation (one-time, plain JAX): transposes, scale folding,
# kv = LayerNorm(latents) @ wkv^T precompute (pure function of params).
# ---------------------------------------------------------------------------
def prepare_params(raw, *, heads, dim_head, eps=1e-5):
    f32 = jnp.float32
    scale = dim_head ** (-0.5)
    D = raw["latents"].shape[-1]
    latents_n = _layernorm_f32(raw["latents"].astype(f32),
                               raw["ln_ctx_g"].astype(f32),
                               raw["ln_ctx_b"].astype(f32), eps)
    kv = latents_n @ raw["wkv"].T.astype(f32)            # (num_latents, 2*inner)
    return {
        "wq_t": (raw["wq"].T * scale).astype(f32),
        "kv": kv.astype(f32),
        "wo_t": raw["wo"].T.astype(f32),
        "w_ff1_t": raw["w_ff1"].T.astype(f32),
        "b_ff1": raw["b_ff1"].reshape(1, -1).astype(f32),
        "w_ff2_t": raw["w_ff2"].T.astype(f32),
        "b_ff2": raw["b_ff2"].reshape(1, -1).astype(f32),
        "ln_attn_g": raw["ln_attn_g"].reshape(1, D).astype(f32),
        "ln_attn_b": raw["ln_attn_b"].reshape(1, D).astype(f32),
        "ln_ff_g": raw["ln_ff_g"].reshape(1, D).astype(f32),
        "ln_ff_b": raw["ln_ff_b"].reshape(1, D).astype(f32),
    }


# ---------------------------------------------------------------------------
# Forward pass (Pallas fused block + tiny JAX pooling epilogue)
# ---------------------------------------------------------------------------
def latent_attention_forward(prepared, embeddings, attention_mask=None, *,
                             heads, dim_head):
    B, N, D = embeddings.shape
    out2d = fused_latent_block(embeddings.reshape(B * N, D), prepared,
                               heads=heads, dim_head=dim_head)
    hiddens = out2d.reshape(B, N, D)

    # TODO(synk): masked mean-pool + L2-normalize epilogue stays in plain JAX
    # (trivial reductions on a (B, D) result, not a hot path).
    if attention_mask is not None:
        m = attention_mask.astype(jnp.float32)
        s = jnp.sum(hiddens * m[..., None], axis=1)
        d = jnp.sum(m, axis=1, keepdims=True)
        hiddens = s / d
        norm = jnp.sqrt(jnp.sum(hiddens * hiddens, axis=-1, keepdims=True))
        hiddens = hiddens / jnp.maximum(norm, 1e-12)      # output_normalize=True
    return hiddens


# ---------------------------------------------------------------------------
# Pure-JAX reference (mirrors the PyTorch module exactly, from RAW params)
# ---------------------------------------------------------------------------
def reference_forward(raw, embeddings, attention_mask=None, *, heads, dim_head):
    B, N, D = embeddings.shape
    num_latents = raw["latents"].shape[0]
    inner = heads * dim_head
    scale = dim_head ** (-0.5)

    hiddens = embeddings
    latents = jnp.broadcast_to(raw["latents"][None], (B, num_latents, D))
    xq = _layernorm_f32(hiddens, raw["ln_attn_g"], raw["ln_attn_b"], 1e-5)
    xc = _layernorm_f32(latents, raw["ln_ctx_g"], raw["ln_ctx_b"], 1e-5)

    q = xq @ raw["wq"].T
    kv = xc @ raw["wkv"].T
    k, v = kv[..., :inner], kv[..., inner:]

    def split(t):
        return t.reshape(B, -1, heads, dim_head).transpose(0, 2, 1, 3)

    qh, kh, vh = split(q), split(k), split(v)
    s = jnp.einsum("bhnd,bhmd->bhnm", qh, kh) * scale
    p = jax.nn.softmax(s, axis=-1)
    o = jnp.einsum("bhnm,bhmd->bhnd", p, vh)
    o = o.transpose(0, 2, 1, 3).reshape(B, N, inner)
    hiddens = o @ raw["wo"].T + hiddens

    xf = _layernorm_f32(hiddens, raw["ln_ff_g"], raw["ln_ff_b"], 1e-5)
    h1 = xf @ raw["w_ff1"].T + raw["b_ff1"]
    F = h1.shape[-1] // 2
    gg = h1[..., :F] * jax.nn.gelu(h1[..., F:], approximate=False)
    hiddens = gg @ raw["w_ff2"].T + raw["b_ff2"] + hiddens

    if attention_mask is not None:
        m = attention_mask.astype(jnp.float32)
        s_ = jnp.sum(hiddens * m[..., None], axis=1)
        d = jnp.sum(m, axis=1, keepdims=True)
        hiddens = s_ / d
        norm = jnp.sqrt(jnp.sum(hiddens * hiddens, axis=-1, keepdims=True))
        hiddens = hiddens / jnp.maximum(norm, 1e-12)
    return hiddens


# ---------------------------------------------------------------------------
if __name__ == "__main__":
    # LatentAttentionModel config (EMBEDDING_DIM == 4096 branch), small demo sizes.
    REDUCED_DIM = 128                       # latent_dim == dim == REDUCED_DIM
    num_latents, cross_heads, cross_dim_head = 32, 2, 32
    batch, seq, mult = 2, 8, 4
    dim = REDUCED_DIM
    inner = cross_heads * cross_dim_head

    key = jax.random.PRNGKey(0)
    ks = jax.random.split(key, 16)

    embeddings = jax.random.normal(ks[0], (batch, seq, dim), jnp.float32)
    attention_mask = jnp.concatenate(
        [jnp.ones((1, seq), jnp.float32),
         jnp.concatenate([jnp.ones((1, seq // 2), jnp.float32),
                          jnp.zeros((1, seq - seq // 2), jnp.float32)], axis=1)],
        axis=0)

    def w(k, shape, s=0.05):
        return jax.random.normal(k, shape, jnp.float32) * s

    # Raw torch-layout (out, in) parameters.
    raw_params = {
        "latents": jax.random.normal(ks[8], (num_latents, dim), jnp.float32),
        "ln_attn_g": 1.0 + 0.1 * jax.random.normal(ks[9], (dim,), jnp.float32),
        "ln_attn_b": 0.1 * jax.random.normal(ks[10], (dim,), jnp.float32),
        "ln_ctx_g": 1.0 + 0.1 * jax.random.normal(ks[11], (dim,), jnp.float32),
        "ln_ctx_b": 0.1 * jax.random.normal(ks[12], (dim,), jnp.float32),
        "ln_ff_g": 1.0 + 0.1 * jax.random.normal(ks[13], (dim,), jnp.float32),
        "ln_ff_b": 0.1 * jax.random.normal(ks[14], (dim,), jnp.float32),
        "wq": w(ks[1], (inner, dim)),
        "wkv": w(ks[2], (2 * inner, dim)),
        "wo": w(ks[3], (dim, inner)),
        "w_ff1": w(ks[4], (dim * mult * 2, dim)),
        "b_ff1": w(ks[5], (dim * mult * 2,), 0.02),
        "w_ff2": w(ks[6], (dim, dim * mult)),
        "b_ff2": w(ks[7], (dim,), 0.02),
    }

    # One-time parameter prep: transposes, scale folding, kv precompute.
    params = prepare_params(raw_params, heads=cross_heads, dim_head=cross_dim_head)

    fwd = jax.jit(functools.partial(latent_attention_forward,
                                    heads=cross_heads, dim_head=cross_dim_head))

    out_pooled = jax.block_until_ready(fwd(params, embeddings, attention_mask))
    out_seq = jax.block_until_ready(fwd(params, embeddings, None))

    ref_pooled = reference_forward(raw_params, embeddings, attention_mask,
                                   heads=cross_heads, dim_head=cross_dim_head)
    ref_seq = reference_forward(raw_params, embeddings, None,
                                heads=cross_heads, dim_head=cross_dim_head)

    assert out_pooled.shape == (batch, dim)
    assert out_seq.shape == (batch, seq, dim)
    assert jnp.allclose(out_pooled, ref_pooled, atol=2e-3, rtol=2e-3), \
        "masked/pooled output mismatch vs reference"
    assert jnp.allclose(out_seq, ref_seq, atol=2e-3, rtol=2e-3), \
        "sequence output mismatch vs reference"

    print("KERNEL_OK")
</pallas_src>

<mosaic_0001>
module attributes {stable_mosaic.version = 11 : i64} {
  func.func @_fused_block_kernel(%arg0: i32, %arg1: memref<16x128xf32, #tpu.memory_space<vmem>>, %arg2: memref<128x64xf32, #tpu.memory_space<vmem>>, %arg3: memref<32x128xf32, #tpu.memory_space<vmem>>, %arg4: memref<64x128xf32, #tpu.memory_space<vmem>>, %arg5: memref<128x1024xf32, #tpu.memory_space<vmem>>, %arg6: memref<1x1024xf32, #tpu.memory_space<vmem>>, %arg7: memref<512x128xf32, #tpu.memory_space<vmem>>, %arg8: memref<1x128xf32, #tpu.memory_space<vmem>>, %arg9: memref<1x128xf32, #tpu.memory_space<vmem>>, %arg10: memref<1x128xf32, #tpu.memory_space<vmem>>, %arg11: memref<1x128xf32, #tpu.memory_space<vmem>>, %arg12: memref<1x128xf32, #tpu.memory_space<vmem>>, %arg13: memref<16x128xf32, #tpu.memory_space<vmem>>) attributes {dimension_semantics = [#tpu.dimension_semantics<parallel>], iteration_bounds = array<i64: 1>, scalar_prefetch = 0 : i64, scratch_operands = 0 : i64, tpu.core_type = #tpu.core_type<tc>, window_params = [{transform_indices = @transform_0, window_bounds = array<i64: 16, 128>}, {pipeline_mode = #tpu.pipeline_mode<synchronous>, transform_indices = @transform_1, window_bounds = array<i64: 128, 64>}, {pipeline_mode = #tpu.pipeline_mode<synchronous>, transform_indices = @transform_2, window_bounds = array<i64: 32, 128>}, {pipeline_mode = #tpu.pipeline_mode<synchronous>, transform_indices = @transform_3, window_bounds = array<i64: 64, 128>}, {pipeline_mode = #tpu.pipeline_mode<synchronous>, transform_indices = @transform_4, window_bounds = array<i64: 128, 1024>}, {pipeline_mode = #tpu.pipeline_mode<synchronous>, transform_indices = @transform_5, window_bounds = array<i64: 1, 1024>}, {pipeline_mode = #tpu.pipeline_mode<synchronous>, transform_indices = @transform_6, window_bounds = array<i64: 512, 128>}, {pipeline_mode = #tpu.pipeline_mode<synchronous>, transform_indices = @transform_7, window_bounds = array<i64: 1, 128>}, {pipeline_mode = #tpu.pipeline_mode<synchronous>, transform_indices = @transform_8, window_bounds = array<i64: 1, 128>}, {pipeline_mode = #tpu.pipeline_mode<synchronous>, transform_indices = @transform_9, window_bounds = array<i64: 1, 128>}, {pipeline_mode = #tpu.pipeline_mode<synchronous>, transform_indices = @transform_10, window_bounds = array<i64: 1, 128>}, {pipeline_mode = #tpu.pipeline_mode<synchronous>, transform_indices = @transform_11, window_bounds = array<i64: 1, 128>}, {transform_indices = @transform_12, window_bounds = array<i64: 16, 128>}]} {
    %c0 = arith.constant 0 : index
    %c0_0 = arith.constant 0 : index
    %0 = vector.load %arg1[%c0, %c0_0] : memref<16x128xf32, #tpu.memory_space<vmem>>, vector<16x128xf32>
    %c0_1 = arith.constant 0 : index
    %c0_2 = arith.constant 0 : index
    %1 = vector.load %arg9[%c0_1, %c0_2] : memref<1x128xf32, #tpu.memory_space<vmem>>, vector<1x128xf32>
    %c0_3 = arith.constant 0 : index
    %c0_4 = arith.constant 0 : index
    %2 = vector.load %arg10[%c0_3, %c0_4] : memref<1x128xf32, #tpu.memory_space<vmem>>, vector<1x128xf32>
    %cst = arith.constant dense<0.000000e+00> : vector<16xf32>
    %3 = vector.multi_reduction <add>, %0, %cst [1] : vector<16x128xf32> to vector<16xf32>
    %4 = vector.shape_cast %3 : vector<16xf32> to vector<16x1xf32>
    %cst_5 = arith.constant 1.280000e+02 : f32
    %5 = vector.broadcast %cst_5 : f32 to vector<16x1xf32>
    %6 = arith.divf %4, %5 : vector<16x1xf32>
    %7 = vector.broadcast %6 : vector<16x1xf32> to vector<16x128xf32>
    %8 = arith.subf %0, %7 : vector<16x128xf32>
    %9 = arith.mulf %8, %8 : vector<16x128xf32>
    %cst_6 = arith.constant dense<0.000000e+00> : vector<16xf32>
    %10 = vector.multi_reduction <add>, %9, %cst_6 [1] : vector<16x128xf32> to vector<16xf32>
    %11 = vector.shape_cast %10 : vector<16xf32> to vector<16x1xf32>
    %cst_7 = arith.constant 1.280000e+02 : f32
    %12 = vector.broadcast %cst_7 : f32 to vector<16x1xf32>
    %13 = arith.divf %11, %12 : vector<16x1xf32>
    %cst_8 = arith.constant 9.99999974E-6 : f32
    %14 = vector.broadcast %cst_8 : f32 to vector<16x1xf32>
    %15 = arith.addf %13, %14 : vector<16x1xf32>
    %16 = math.rsqrt %15 : vector<16x1xf32>
    %17 = vector.broadcast %16 : vector<16x1xf32> to vector<16x128xf32>
    %18 = arith.mulf %8, %17 : vector<16x128xf32>
    %19 = vector.broadcast %1 : vector<1x128xf32> to vector<16x128xf32>
    %20 = arith.mulf %18, %19 : vector<16x128xf32>
    %21 = vector.broadcast %2 : vector<1x128xf32> to vector<16x128xf32>
    %22 = arith.addf %20, %21 : vector<16x128xf32>
    %c0_9 = arith.constant 0 : index
    %c0_10 = arith.constant 0 : index
    %23 = vector.load %arg2[%c0_9, %c0_10] : memref<128x64xf32, #tpu.memory_space<vmem>>, vector<128x64xf32>
    %cst_11 = arith.constant dense<0.000000e+00> : vector<16x64xf32>
    %24 = tpu.matmul %22, %23, %cst_11 {dimension_numbers = #tpu.dot_dimension_numbers<[1], [0], [0], [1], [0, 0, 1, 1], [], []>} : vector<16x128xf32>, vector<128x64xf32>, vector<16x64xf32> -> vector<16x64xf32>
    %c0_12 = arith.constant 0 : index
    %c0_13 = arith.constant 0 : index
    %25 = vector.load %arg3[%c0_12, %c0_13] : memref<32x128xf32, #tpu.memory_space<vmem>>, vector<32x128xf32>
    %c0_14 = arith.constant 0 : index
    %c0_15 = arith.constant 0 : index
    %26 = vector.load %arg4[%c0_14, %c0_15] : memref<64x128xf32, #tpu.memory_space<vmem>>, vector<64x128xf32>
    %cst_16 = arith.constant 0.000000e+00 : f32
    %27 = vector.broadcast %cst_16 : f32 to vector<16x128xf32>
    %28 = vector.extract_strided_slice %24 {offsets = [0, 0], sizes = [16, 32], strides = [1, 1]} : vector<16x64xf32> to vector<16x32xf32>
    %29 = vector.extract_strided_slice %25 {offsets = [0, 0], sizes = [32, 32], strides = [1, 1]} : vector<32x128xf32> to vector<32x32xf32>
    %30 = vector.extract_strided_slice %25 {offsets = [0, 64], sizes = [32, 32], strides = [1, 1]} : vector<32x128xf32> to vector<32x32xf32>
    %cst_17 = arith.constant dense<0.000000e+00> : vector<16x32xf32>
    %31 = tpu.matmul %28, %29, %cst_17 {dimension_numbers = #tpu.dot_dimension_numbers<[1], [1], [0], [0], [0, 0, 1, 0], [], []>} : vector<16x32xf32>, vector<32x32xf32>, vector<16x32xf32> -> vector<16x32xf32>
    %cst_18 = arith.constant dense<0xFF800000> : vector<16xf32>
    %32 = vector.multi_reduction <maximumf>, %31, %cst_18 [1] : vector<16x32xf32> to vector<16xf32>
    %33 = vector.shape_cast %32 : vector<16xf32> to vector<16x1xf32>
    %34 = vector.broadcast %33 : vector<16x1xf32> to vector<16x32xf32>
    %35 = arith.subf %31, %34 : vector<16x32xf32>
    %36 = math.exp %35 : vector<16x32xf32>
    %cst_19 = arith.constant dense<0.000000e+00> : vector<16xf32>
    %37 = vector.multi_reduction <add>, %36, %cst_19 [1] : vector<16x32xf32> to vector<16xf32>
    %38 = vector.shape_cast %37 : vector<16xf32> to vector<16x1xf32>
    %39 = tpu.reciprocal %38 {approx = true} : vector<16x1xf32> -> vector<16x1xf32>
    %40 = vector.broadcast %39 : vector<16x1xf32> to vector<16x32xf32>
    %41 = arith.mulf %36, %40 : vector<16x32xf32>
    %cst_20 = arith.constant dense<0.000000e+00> : vector<16x32xf32>
    %42 = tpu.matmul %41, %30, %cst_20 {dimension_numbers = #tpu.dot_dimension_numbers<[1], [0], [0], [1], [0, 0, 1, 1], [], []>} : vector<16x32xf32>, vector<32x32xf32>, vector<16x32xf32> -> vector<16x32xf32>
    %43 = vector.extract_strided_slice %26 {offsets = [0, 0], sizes = [32, 128], strides = [1, 1]} : vector<64x128xf32> to vector<32x128xf32>
    %cst_21 = arith.constant dense<0.000000e+00> : vector<16x128xf32>
    %44 = tpu.matmul %42, %43, %cst_21 {dimension_numbers = #tpu.dot_dimension_numbers<[1], [0], [0], [1], [0, 0, 1, 1], [], []>} : vector<16x32xf32>, vector<32x128xf32>, vector<16x128xf32> -> vector<16x128xf32>
    %45 = arith.addf %27, %44 : vector<16x128xf32>
    %46 = vector.extract_strided_slice %24 {offsets = [0, 32], sizes = [16, 32], strides = [1, 1]} : vector<16x64xf32> to vector<16x32xf32>
    %47 = vector.extract_strided_slice %25 {offsets = [0, 32], sizes = [32, 32], strides = [1, 1]} : vector<32x128xf32> to vector<32x32xf32>
    %48 = vector.extract_strided_slice %25 {offsets = [0, 96], sizes = [32, 32], strides = [1, 1]} : vector<32x128xf32> to vector<32x32xf32>
    %cst_22 = arith.constant dense<0.000000e+00> : vector<16x32xf32>
    %49 = tpu.matmul %46, %47, %cst_22 {dimension_numbers = #tpu.dot_dimension_numbers<[1], [1], [0], [0], [0, 0, 1, 0], [], []>} : vector<16x32xf32>, vector<32x32xf32>, vector<16x32xf32> -> vector<16x32xf32>
    %cst_23 = arith.constant dense<0xFF800000> : vector<16xf32>
    %50 = vector.multi_reduction <maximumf>, %49, %cst_23 [1] : vector<16x32xf32> to vector<16xf32>
    %51 = vector.shape_cast %50 : vector<16xf32> to vector<16x1xf32>
    %52 = vector.broadcast %51 : vector<16x1xf32> to vector<16x32xf32>
    %53 = arith.subf %49, %52 : vector<16x32xf32>
    %54 = math.exp %53 : vector<16x32xf32>
    %cst_24 = arith.constant dense<0.000000e+00> : vector<16xf32>
    %55 = vector.multi_reduction <add>, %54, %cst_24 [1] : vector<16x32xf32> to vector<16xf32>
    %56 = vector.shape_cast %55 : vector<16xf32> to vector<16x1xf32>
    %57 = tpu.reciprocal %56 {approx = true} : vector<16x1xf32> -> vector<16x1xf32>
    %58 = vector.broadcast %57 : vector<16x1xf32> to vector<16x32xf32>
    %59 = arith.mulf %54, %58 : vector<16x32xf32>
    %cst_25 = arith.constant dense<0.000000e+00> : vector<16x32xf32>
    %60 = tpu.matmul %59, %48, %cst_25 {dimension_numbers = #tpu.dot_dimension_numbers<[1], [0], [0], [1], [0, 0, 1, 1], [], []>} : vector<16x32xf32>, vector<32x32xf32>, vector<16x32xf32> -> vector<16x32xf32>
    %61 = vector.extract_strided_slice %26 {offsets = [32, 0], sizes = [32, 128], strides = [1, 1]} : vector<64x128xf32> to vector<32x128xf32>
    %cst_26 = arith.constant dense<0.000000e+00> : vector<16x128xf32>
    %62 = tpu.matmul %60, %61, %cst_26 {dimension_numbers = #tpu.dot_dimension_numbers<[1], [0], [0], [1], [0, 0, 1, 1], [], []>} : vector<16x32xf32>, vector<32x128xf32>, vector<16x128xf32> -> vector<16x128xf32>
    %63 = arith.addf %45, %62 : vector<16x128xf32>
    %64 = arith.addf %0, %63 : vector<16x128xf32>
    %c0_27 = arith.constant 0 : index
    %c0_28 = arith.constant 0 : index
    %65 = vector.load %arg11[%c0_27, %c0_28] : memref<1x128xf32, #tpu.memory_space<vmem>>, vector<1x128xf32>
    %c0_29 = arith.constant 0 : index
    %c0_30 = arith.constant 0 : index
    %66 = vector.load %arg12[%c0_29, %c0_30] : memref<1x128xf32, #tpu.memory_space<vmem>>, vector<1x128xf32>
    %cst_31 = arith.constant dense<0.000000e+00> : vector<16xf32>
    %67 = vector.multi_reduction <add>, %64, %cst_31 [1] : vector<16x128xf32> to vector<16xf32>
    %68 = vector.shape_cast %67 : vector<16xf32> to vector<16x1xf32>
    %cst_32 = arith.constant 1.280000e+02 : f32
    %69 = vector.broadcast %cst_32 : f32 to vector<16x1xf32>
    %70 = arith.divf %68, %69 : vector<16x1xf32>
    %71 = vector.broadcast %70 : vector<16x1xf32> to vector<16x128xf32>
    %72 = arith.subf %64, %71 : vector<16x128xf32>
    %73 = arith.mulf %72, %72 : vector<16x128xf32>
    %cst_33 = arith.constant dense<0.000000e+00> : vector<16xf32>
    %74 = vector.multi_reduction <add>, %73, %cst_33 [1] : vector<16x128xf32> to vector<16xf32>
    %75 = vector.shape_cast %74 : vector<16xf32> to vector<16x1xf32>
    %cst_34 = arith.constant 1.280000e+02 : f32
    %76 = vector.broadcast %cst_34 : f32 to vector<16x1xf32>
    %77 = arith.divf %75, %76 : vector<16x1xf32>
    %cst_35 = arith.constant 9.99999974E-6 : f32
    %78 = vector.broadcast %cst_35 : f32 to vector<16x1xf32>
    %79 = arith.addf %77, %78 : vector<16x1xf32>
    %80 = math.rsqrt %79 : vector<16x1xf32>
    %81 = vector.broadcast %80 : vector<16x1xf32> to vector<16x128xf32>
    %82 = arith.mulf %72, %81 : vector<16x128xf32>
    %83 = vector.broadcast %65 : vector<1x128xf32> to vector<16x128xf32>
    %84 = arith.mulf %82, %83 : vector<16x128xf32>
    %85 = vector.broadcast %66 : vector<1x128xf32> to vector<16x128xf32>
    %86 = arith.addf %84, %85 : vector<16x128xf32>
    %c0_36 = arith.constant 0 : index
    %c0_37 = arith.constant 0 : index
    %87 = vector.load %arg5[%c0_36, %c0_37] : memref<128x1024xf32, #tpu.memory_space<vmem>>, vector<128x1024xf32>
    %cst_38 = arith.constant dense<0.000000e+00> : vector<16x1024xf32>
    %88 = tpu.matmul %86, %87, %cst_38 {dimension_numbers = #tpu.dot_dimension_numbers<[1], [0], [0], [1], [0, 0, 1, 1], [], []>} : vector<16x128xf32>, vector<128x1024xf32>, vector<16x1024xf32> -> vector<16x1024xf32>
    %c0_39 = arith.constant 0 : index
    %c0_40 = arith.constant 0 : index
    %89 = vector.load %arg6[%c0_39, %c0_40] : memref<1x1024xf32, #tpu.memory_space<vmem>>, vector<1x1024xf32>
    %90 = vector.broadcast %89 : vector<1x1024xf32> to vector<16x1024xf32>
    %91 = arith.addf %88, %90 : vector<16x1024xf32>
    %92 = vector.extract_strided_slice %91 {offsets = [0, 0], sizes = [16, 512], strides = [1, 1]} : vector<16x1024xf32> to vector<16x512xf32>
    %93 = vector.extract_strided_slice %91 {offsets = [0, 512], sizes = [16, 512], strides = [1, 1]} : vector<16x1024xf32> to vector<16x512xf32>
    %cst_41 = arith.constant 5.000000e-01 : f32
    %94 = vector.broadcast %cst_41 : f32 to vector<16x512xf32>
    %95 = arith.mulf %94, %93 : vector<16x512xf32>
    %cst_42 = arith.constant 0.707106769 : f32
    %96 = vector.broadcast %cst_42 : f32 to vector<16x512xf32>
    %97 = arith.mulf %93, %96 : vector<16x512xf32>
    %98 = math.absf %97 : vector<16x512xf32>
    %cst_43 = arith.constant 0.327591091 : f32
    %99 = vector.broadcast %cst_43 : f32 to vector<16x512xf32>
    %100 = arith.mulf %99, %98 : vector<16x512xf32>
    %cst_44 = arith.constant 1.000000e+00 : f32
    %101 = vector.broadcast %cst_44 : f32 to vector<16x512xf32>
    %102 = arith.addf %101, %100 : vector<16x512xf32>
    %cst_45 = arith.constant 1.000000e+00 : f32
    %103 = vector.broadcast %cst_45 : f32 to vector<16x512xf32>
    %104 = arith.divf %103, %102 : vector<16x512xf32>
    %cst_46 = arith.constant 1.06140542 : f32
    %105 = vector.broadcast %cst_46 : f32 to vector<16x512xf32>
    %106 = arith.mulf %104, %105 : vector<16x512xf32>
    %cst_47 = arith.constant -1.45315206 : f32
    %107 = vector.broadcast %cst_47 : f32 to vector<16x512xf32>
    %108 = arith.addf %107, %106 : vector<16x512xf32>
    %109 = arith.mulf %104, %108 : vector<16x512xf32>
    %cst_48 = arith.constant 1.42141378 : f32
    %110 = vector.broadcast %cst_48 : f32 to vector<16x512xf32>
    %111 = arith.addf %110, %109 : vector<16x512xf32>
    %112 = arith.mulf %104, %111 : vector<16x512xf32>
    %cst_49 = arith.constant -0.284496725 : f32
    %113 = vector.broadcast %cst_49 : f32 to vector<16x512xf32>
    %114 = arith.addf %113, %112 : vector<16x512xf32>
    %115 = arith.mulf %104, %114 : vector<16x512xf32>
    %cst_50 = arith.constant 0.254829586 : f32
    %116 = vector.broadcast %cst_50 : f32 to vector<16x512xf32>
    %117 = arith.addf %116, %115 : vector<16x512xf32>
    %118 = arith.mulf %104, %117 : vector<16x512xf32>
    %cst_51 = arith.constant 0.000000e+00 : f32
    %119 = vector.broadcast %cst_51 : f32 to vector<16x512xf32>
    %120 = arith.subf %119, %98 : vector<16x512xf32>
    %121 = arith.mulf %120, %98 : vector<16x512xf32>
    %122 = math.exp %121 : vector<16x512xf32>
    %123 = arith.mulf %118, %122 : vector<16x512xf32>
    %cst_52 = arith.constant 1.000000e+00 : f32
    %124 = vector.broadcast %cst_52 : f32 to vector<16x512xf32>
    %125 = arith.subf %124, %123 : vector<16x512xf32>
    %cst_53 = arith.constant 0.000000e+00 : f32
    %126 = vector.broadcast %cst_53 : f32 to vector<16x512xf32>
    %127 = arith.cmpf oge, %97, %126 : vector<16x512xf32>
    %cst_54 = arith.constant 0.000000e+00 : f32
    %128 = vector.broadcast %cst_54 : f32 to vector<16x512xf32>
    %129 = arith.subf %128, %125 : vector<16x512xf32>
    %130 = arith.select %127, %125, %129 : vector<16x512xi1>, vector<16x512xf32>
    %cst_55 = arith.constant 1.000000e+00 : f32
    %131 = vector.broadcast %cst_55 : f32 to vector<16x512xf32>
    %132 = arith.addf %131, %130 : vector<16x512xf32>
    %133 = arith.mulf %95, %132 : vector<16x512xf32>
    %134 = arith.mulf %92, %133 : vector<16x512xf32>
    %c0_56 = arith.constant 0 : index
    %c0_57 = arith.constant 0 : index
    %135 = vector.load %arg7[%c0_56, %c0_57] : memref<512x128xf32, #tpu.memory_space<vmem>>, vector<512x128xf32>
    %cst_58 = arith.constant dense<0.000000e+00> : vector<16x128xf32>
    %136 = tpu.matmul %134, %135, %cst_58 {dimension_numbers = #tpu.dot_dimension_numbers<[1], [0], [0], [1], [0, 0, 1, 1], [], []>} : vector<16x512xf32>, vector<512x128xf32>, vector<16x128xf32> -> vector<16x128xf32>
    %c0_59 = arith.constant 0 : index
    %c0_60 = arith.constant 0 : index
    %137 = vector.load %arg8[%c0_59, %c0_60] : memref<1x128xf32, #tpu.memory_space<vmem>>, vector<1x128xf32>
    %138 = vector.broadcast %137 : vector<1x128xf32> to vector<16x128xf32>
    %139 = arith.addf %136, %138 : vector<16x128xf32>
    %140 = arith.addf %64, %139 : vector<16x128xf32>
    %c0_61 = arith.constant 0 : index
    %c0_62 = arith.constant 0 : index
    %141 = vector.load %arg13[%c0_61, %c0_62] : memref<16x128xf32, #tpu.memory_space<vmem>>, vector<16x128xf32>
    tpu.vector_store %arg13[%c0_61, %c0_62], %140 {strides = array<i32>} : memref<16x128xf32, #tpu.memory_space<vmem>>, vector<16x128xf32>,
    return
  }
  func.func @transform_0(%arg0: i32) -> (i32, i32) {
    %c0_i32 = arith.constant 0 : i32
    %c0_i32_0 = arith.constant 0 : i32
    return %arg0, %c0_i32 : i32, i32
  }
  func.func @transform_1(%arg0: i32) -> (i32, i32) {
    %c0_i32 = arith.constant 0 : i32
    %c0_i32_0 = arith.constant 0 : i32
    %c0_i32_1 = arith.constant 0 : i32
    return %c0_i32, %c0_i32_0 : i32, i32
  }
  func.func @transform_2(%arg0: i32) -> (i32, i32) {
    %c0_i32 = arith.constant 0 : i32
    %c0_i32_0 = arith.constant 0 : i32
    %c0_i32_1 = arith.constant 0 : i32
    return %c0_i32, %c0_i32_0 : i32, i32
  }
  func.func @transform_3(%arg0: i32) -> (i32, i32) {
    %c0_i32 = arith.constant 0 : i32
    %c0_i32_0 = arith.constant 0 : i32
    %c0_i32_1 = arith.constant 0 : i32
    return %c0_i32, %c0_i32_0 : i32, i32
  }
  func.func @transform_4(%arg0: i32) -> (i32, i32) {
    %c0_i32 = arith.constant 0 : i32
    %c0_i32_0 = arith.constant 0 : i32
    %c0_i32_1 = arith.constant 0 : i32
    return %c0_i32, %c0_i32_0 : i32, i32
  }
  func.func @transform_5(%arg0: i32) -> (i32, i32) {
    %c0_i32 = arith.constant 0 : i32
    %c0_i32_0 = arith.constant 0 : i32
    %c0_i32_1 = arith.constant 0 : i32
    return %c0_i32, %c0_i32_0 : i32, i32
  }
  func.func @transform_6(%arg0: i32) -> (i32, i32) {
    %c0_i32 = arith.constant 0 : i32
    %c0_i32_0 = arith.constant 0 : i32
    %c0_i32_1 = arith.constant 0 : i32
    return %c0_i32, %c0_i32_0 : i32, i32
  }
  func.func @transform_7(%arg0: i32) -> (i32, i32) {
    %c0_i32 = arith.constant 0 : i32
    %c0_i32_0 = arith.constant 0 : i32
    %c0_i32_1 = arith.constant 0 : i32
    return %c0_i32, %c0_i32_0 : i32, i32
  }
  func.func @transform_8(%arg0: i32) -> (i32, i32) {
    %c0_i32 = arith.constant 0 : i32
    %c0_i32_0 = arith.constant 0 : i32
    %c0_i32_1 = arith.constant 0 : i32
    return %c0_i32, %c0_i32_0 : i32, i32
  }
  func.func @transform_9(%arg0: i32) -> (i32, i32) {
    %c0_i32 = arith.constant 0 : i32
    %c0_i32_0 = arith.constant 0 : i32
    %c0_i32_1 = arith.constant 0 : i32
    return %c0_i32, %c0_i32_0 : i32, i32
  }
  func.func @transform_10(%arg0: i32) -> (i32, i32) {
    %c0_i32 = arith.constant 0 : i32
    %c0_i32_0 = arith.constant 0 : i32
    %c0_i32_1 = arith.constant 0 : i32
    return %c0_i32, %c0_i32_0 : i32, i32
  }
  func.func @transform_11(%arg0: i32) -> (i32, i32) {
    %c0_i32 = arith.constant 0 : i32
    %c0_i32_0 = arith.constant 0 : i32
    %c0_i32_1 = arith.constant 0 : i32
    return %c0_i32, %c0_i32_0 : i32, i32
  }
  func.func @transform_12(%arg0: i32) -> (i32, i32) {
    %c0_i32 = arith.constant 0 : i32
    %c0_i32_0 = arith.constant 0 : i32
    return %arg0, %c0_i32 : i32, i32
  }
}

</mosaic_0001>

<bundles_post_ra>
// kernel: latent_attention_forward.1
= control target key start
LH: loop header
LB: loop body
LE: loop exit
PB: predicated region body
PF: predicated region fallthrough
CT: control target
= control target key end

     0   :  { %17 = vsyncpa [#allocation3], 0  ;;  %s2959_s0 = inlined_call_operand.vmem [shape: f32[16,128], index: 0, kind: input, shape index: {}]   ;;  %s2960_s1 = inlined_call_operand.vmem [shape: f32[128,64], index: 1, kind: input, shape index: {}]   ;;  %s2961_s2 = inlined_call_operand.vmem [shape: f32[32,128], index: 2, kind: input, shape index: {}]   ;;  %s2962_s3 = inlined_call_operand.vmem [shape: f32[64,128], index: 3, kind: input, shape index: {}]   ;;  %s2963_s4 = inlined_call_operand.hbm [shape: f32[128,1024], index: 4, kind: input, shape index: {}]   ;;  %s2964_s5 = inlined_call_operand.vmem [shape: f32[1,1024], index: 5, kind: input, shape index: {}]   ;;  %s2965_s6 = inlined_call_operand.hbm [shape: f32[512,128], index: 6, kind: input, shape index: {}]   ;;  %s2966_s7 = inlined_call_operand.vmem [shape: f32[1,128], index: 7, kind: input, shape index: {}]   ;;  %s2967_s8 = inlined_call_operand.vmem [shape: f32[1,128], index: 8, kind: input, shape index: {}]   ;;  %s2968_s9 = inlined_call_operand.vmem [shape: f32[1,128], index: 9, kind: input, shape index: {}]   ;;  %s2969_s10 = inlined_call_operand.vmem [shape: f32[1,128], index: 10, kind: input, shape index: {}]   ;;  %s2970_s11 = inlined_call_operand.vmem [shape: f32[1,128], index: 11, kind: input, shape index: {}]   ;;  %s2971_s12 = inlined_call_operand.vmem [shape: f32[16,128], index: 12, kind: output, shape index: {}]  }
   0x1   :  { %18 = vsyncpa [#allocation5], 0  ;;  %s2456_s21 = smov [#allocation2]   ;;  %s2408_s25 = scalar_lea.hbm %s2963_s4, 16384 }
   0x2   :  { %s32_s22 = sshll.u32 %s2456_s21, 4  ;;  %p2409_p0 = scmp.ne.s32.totalorder %s2963_s4, %s2408_s25  ;;  %s33_s22 = int_to_ptr.vmem [resolvable:$true] %s32_s22 }
   0x3   :  { %p2412_p1 = scmp.lt.u32.totalorder %s2408_s25, %s2963_s4 }
   0x5   :  { %p2414_p2 = pnand %p2412_p1, %p2409_p0 }
   0x7   :  { %2417 = shalt.err (!%p2414_p2)
}
   0x8   :  { %s2418_s30 = scalar_lea.vmem %s33_s22, 16384  ;;  %p2423_p4 = scmp.lt.s32.totalorder %s33_s22, %s33_s22 }
   0x9   :  { %p2419_p3 = scmp.ne.s32.totalorder %s33_s22, %s2418_s30  ;;  %p2424_p5 = scmp.lt.s32.totalorder %s2418_s30, %s2418_s30 }
   0xb   :  { %p2425_p6 = por %p2424_p5, %p2423_p4 }
   0xd   :  { %p2426_p7 = pnand %p2425_p6, %p2419_p3 }
   0xf   :  { %2429 = shalt.err (!%p2426_p7)
}
  0x10   :  { %s2457_s13 = smov 1024   ;;  %s2458_s14 = smov 64  }
  0x11   :  { %38 = dma.hbm_to_vmem [thread:$0]  %s2963_s4, 16384, %s33_s22, [#allocation3], %s2457_s13, %s2457_s13, %s2458_s14  }
  0x12   :  { %s2459_s17 = smov [#allocation4]   ;;  %s2430_s21 = scalar_lea.hbm %s2965_s6, 8192 }
  0x13   :  { %s46_s18 = sshll.u32 %s2459_s17, 4  ;;  %p2431_p8 = scmp.ne.s32.totalorder %s2965_s6, %s2430_s21  ;;  %s47_s18 = int_to_ptr.vmem [resolvable:$true] %s46_s18 }
  0x14   :  { %p2434_p9 = scmp.lt.u32.totalorder %s2430_s21, %s2965_s6 }
  0x16   :  { %p2436_p10 = pnand %p2434_p9, %p2431_p8 }
  0x18   :  { %2439 = shalt.err (!%p2436_p10)
}
  0x19   :  { %s2440_s27 = scalar_lea.vmem %s47_s18, 8192  ;;  %p2445_p12 = scmp.lt.s32.totalorder %s47_s18, %s47_s18 }
  0x1a   :  { %p2441_p11 = scmp.ne.s32.totalorder %s47_s18, %s2440_s27  ;;  %p2446_p13 = scmp.lt.s32.totalorder %s2440_s27, %s2440_s27 }
  0x1c   :  { %p2447_p0 = por %p2446_p13, %p2445_p12 }
  0x1e   :  { %p2448_p1 = pnand %p2447_p0, %p2441_p11 }
  0x20   :  { %2451 = shalt.err (!%p2448_p1)
}
  0x21   :  { %s2460_s4 = smov 128   ;;  %s2461_s22 = smov 8  }
  0x22   :  { %52 = dma.hbm_to_vmem [thread:$0]  %s2965_s6, 8192, %s47_s18, [#allocation5], %s2460_s4, %s2460_s4, %s2461_s22  }
  0x23   :  { %2452 = dma.done.wait [#allocation3], 16384  }
  0x24   :  { %2453 = vsyncadd [#allocation3], 4294950912 }
  0x25   :  { %2454 = dma.done.wait [#allocation5], 8192  }
  0x26   :  { %2455 = vsyncadd [#allocation5], 4294959104  ;;  %v2558_v0 = vld [vmem:[%s2959_s0] sm:$0xff]  ;;  %v2564_v1 = vld [vmem:[%s2959_s0 + $0x8] sm:$0xff]  ;;  %vm215_vm0 = vcmask 261120  }
  0x27   :  { %73 = vadd.xlane.f32.xlu0 %v2558_v0  ;;  %v112_v2 = vld [vmem:[%s2960_s1] sm:$0xff]  ;;  %v113_v3 = vld [vmem:[%s2960_s1 + $0x8] sm:$0xff]  ;;  %v114_v4 = vld [vmem:[%s2960_s1 + $0x10] sm:$0xff] }
  0x28   :  { %v2031_v5 = vpack.c.bf16 %v113_v3, %v112_v2  ;;  %v115_v6 = vld [vmem:[%s2960_s1 + $0x18] sm:$0xff]  ;;  %v116_v16 = vld [vmem:[%s2960_s1 + $0x20] sm:$0xff]  ;;  %v117_v17 = vld [vmem:[%s2960_s1 + $0x28] sm:$0xff] }
  0x29   :  { %v2035_v7 = vpack.c.bf16 %v115_v6, %v114_v4  ;;  %v2039_v18 = vpack.c.bf16 %v117_v17, %v116_v16  ;;  %v118_v19 = vld [vmem:[%s2960_s1 + $0x30] sm:$0xff]  ;;  %v119_v20 = vld [vmem:[%s2960_s1 + $0x38] sm:$0xff]  ;;  %v120_v22 = vld [vmem:[%s2960_s1 + $0x40] sm:$0xff] }
  0x2a   :  { %2032 = vmatprep.subr.bf16.mxu0 %v2031_v5  ;;  %v2043_v21 = vpack.c.bf16 %v119_v20, %v118_v19  ;;  %v121_v23 = vld [vmem:[%s2960_s1 + $0x48] sm:$0xff]  ;;  %v122_v25 = vld [vmem:[%s2960_s1 + $0x50] sm:$0xff]  ;;  %v123_v26 = vld [vmem:[%s2960_s1 + $0x58] sm:$0xff] }
  0x2b   :  { %75 = vadd.xlane.f32.xlu0 %v2564_v1  ;;  %2034 = vmatpush3.bf16.msra.mxu0 %v2031_v5  ;;  %v2047_v24 = vpack.c.bf16 %v121_v23, %v120_v22  ;;  %v124_v27 = vld [vmem:[%s2960_s1 + $0x60] sm:$0xff]  ;;  %v2051_v28 = vpack.c.bf16 %v123_v26, %v122_v25  ;;  %v125_v29 = vld [vmem:[%s2960_s1 + $0x68] sm:$0xff]  ;;  %v126_v31 = vld [vmem:[%s2960_s1 + $0x70] sm:$0xff] }
  0x2c   :  { %2036 = vmatprep.subr.bf16.mxu0 %v2035_v7  ;;  %v2055_v30 = vpack.c.bf16 %v125_v29, %v124_v27  ;;  %v127_v32 = vld [vmem:[%s2960_s1 + $0x78] sm:$0xff]  ;;  %v203_v34 = vld [vmem:[%s2961_s2] sm:$0xff]  ;;  %v204_v35 = vld [vmem:[%s2961_s2 + $0x8] sm:$0xff] }
  0x2d   :  { %v2059_v33 = vpack.c.bf16 %v127_v32, %v126_v31  ;;  %v205_v36 = vld [vmem:[%s2961_s2 + $0x10] sm:$0xff]  ;;  %v2063_v37 = vpack.c.bf16 %v204_v35, %v203_v34  ;;  %vm2628_vm1 = vmpackc.low %vm215_vm0, %vm215_vm0  ;;  %v206_v39 = vld [vmem:[%s2961_s2 + $0x18] sm:$0xff] }
  0x2e   :  { %v2069_v40 = vpack.c.bf16 %v206_v39, %v205_v36  ;;  %v1775_v48 = vld [vmem:[%s2967_s8] ss:$0 sm:$0xff]  ;;  %s2462_s8 = smov 96  }
  0x2f   :  { %2038 = vmatpush3.bf16.msra.mxu0 %v2035_v7  ;;  %2065 = vmatprep.subr.msk.bf16.mxu1 %vm2628_vm1, %v2063_v37  ;;  %v1776_v50 = vld [vmem:[%s2968_s9] ss:$0 sm:$0xff]  ;;  %s2463_s9 = smov 32  }
  0x30   :  { %2040 = vmatprep.subr.bf16.mxu0 %v2039_v18  ;;  %2068 = vmatpush3.bf16.xpose.msk.msra.mxu1 %vm2628_vm1, %v2063_v37 }
  0x31   :  { %2071 = vmatprep.subr.msk.bf16.mxu1 %vm2628_vm1, %v2069_v40 }
  0x33   :  { %2042 = vmatpush3.bf16.msra.mxu0 %v2039_v18 }
  0x34   :  { %2044 = vmatprep.subr.bf16.mxu0 %v2043_v21 }
  0x37   :  { %2046 = vmatpush3.bf16.msra.mxu0 %v2043_v21 }
  0x38   :  { %2048 = vmatprep.subr.bf16.mxu0 %v2047_v24  ;;  %2074 = vmatpush3.bf16.xpose.msk.msra.mxu1 %vm2628_vm1, %v2069_v40 }
  0x3b   :  { %2050 = vmatpush3.bf16.msra.mxu0 %v2047_v24 }
  0x3c   :  { %2052 = vmatprep.subr.bf16.mxu0 %v2051_v28 }
  0x3f   :  { %2054 = vmatpush3.bf16.msra.mxu0 %v2051_v28 }
  0x40   :  { %2056 = vmatprep.subr.bf16.mxu0 %v2055_v30 }
  0x43   :  { %2058 = vmatpush3.bf16.msra.mxu0 %v2055_v30 }
  0x44   :  { %2060 = vmatprep.subr.bf16.mxu0 %v2059_v33 }
  0x47   :  { %2062 = vmatpush3.bf16.msra.mxu0 %v2059_v33 }
  0xb4   :  { %v74_v8 = vpop.xlane.xlu0 %73 }
  0xb5   :  { %v78_v9 = vmul.f32 0.0078125, %v74_v8 }
  0xb7   :  { %v80_v10 = vsub.f32 %v2558_v0, %v78_v9 }
  0xb8   :  { %v76_v11 = vpop.xlane.xlu0 %75 }
  0xb9   :  { %v79_v12 = vmul.f32 0.0078125, %v76_v11  ;;  %v82_v13 = vmul.f32 %v80_v10, %v80_v10  ;;  %v2327_v11 = vpack.i.bf16 %v206_v39, %v205_v36 }
  0xbb   :  { %v81_v14 = vsub.f32 %v2564_v1, %v79_v12  ;;  %84 = vadd.xlane.f32.xlu1 %v82_v13  ;;  %v2656_v12 = vpack.i.bf16 %v204_v35, %v203_v34 }
  0xbd   :  { %v83_v15 = vmul.f32 %v81_v14, %v81_v14 }
  0xbf   :  { %86 = vadd.xlane.f32.xlu1 %v83_v15 }
 0x148   :  { %v85_v41 = vpop.xlane.xlu1 %84 }
 0x149   :  { %v88_v42 = vmul.f32 0.0078125, %v85_v41 }
 0x14b   :  { %v90_v43 = vadd.f32 1e-05, %v88_v42 }
 0x14c   :  { %v87_v44 = vpop.xlane.xlu1 %86 }
 0x14d   :  { %2352 = vrsqrt.f32 %v90_v43  ;;  %v89_v45 = vmul.f32 0.0078125, %v87_v44 }
 0x14f   :  { %v91_v46 = vadd.f32 1e-05, %v89_v45 }
 0x151   :  { %2354 = vrsqrt.f32 %v91_v46 }
 0x157   :  { %v2353_v47 = vpop.eup %2352 }
 0x158   :  { %v94_v49 = vmul.f32 %v2353_v47, %v80_v10 }
 0x15a   :  { %v102_v51 = vmul.f32 %v1775_v48, %v94_v49 }
 0x15b   :  { %v2355_v52 = vpop.eup %2354 }
 0x15c   :  { %v95_v53 = vmul.f32 %v2355_v52, %v81_v14  ;;  %v110_v54 = vadd.f32 %v1776_v50, %v102_v51 }
 0x15e   :  { %v103_v55 = vmul.f32 %v1775_v48, %v95_v53  ;;  %1962 = vmatprep.mubr.f32.mxu0 %v110_v54  ;;  %v211_v53 = vld [vmem:[%s2962_s3 + $0x20] sm:$0xff]  ;;  %v212_v54 = vld [vmem:[%s2962_s3 + $0x28] sm:$0xff] }
 0x160   :  { %v111_v56 = vadd.f32 %v1776_v50, %v103_v55  ;;  %v213_v55 = vld [vmem:[%s2962_s3 + $0x30] sm:$0xff] }
 0x162   :  { %1963 = vmatmul.mubr.f32.vlgmr.msra.gmra.mrb[0].mxu0 %v111_v56  ;;  %v2103_v56 = vpack.c.bf16 %v212_v54, %v211_v53  ;;  %v876_v53 = vld [vmem:[#allocation2 + $0x110] sm:$0xff] }
 0x163   :  { %v884_v54 = vld [vmem:[#allocation2 + $0x150] sm:$0xff] }
 0x164   :  { %2104 = vmatprep.subr.bf16.mxu0 %v2103_v56 }
 0x165   :  { %2106 = vmatpush3.bf16.msra.mxu0 %v2103_v56  ;;  %v2161_v56 = vpack.c.bf16 %v884_v54, %v876_v53 }
 0x235   :  { %v1964_v57 = vpop.f32.mrb[0].mxu0 }
 0x236   :  { %v194_v58 = vpop.f32.mrb[1].mxu0 }
 0x237   :  { %1973 = vmatprep.mubr.msk.f32.mxu1 %vm215_vm0, %v194_v58 }
 0x238   :  { %1974 = vmatmul.mubr.msk.f32.vlgmr.msra.gmra.mrb[0].mxu1 %vm215_vm0, %v1964_v57 }
 0x30b   :  { %v1975_v59 = vpop.f32.mrb[0].mxu1 }
 0x30c   :  { %v300_v60 = vpop.f32.mrb[1].mxu1  ;;  %v312_v61 = vsel %vm215_vm0, %v1975_v59, -inf }
 0x30d   :  { %313 = vmax.xlane.f32.xlu1 %v312_v61  ;;  %v309_v62 = vsel %vm215_vm0, %v300_v60, -inf }
 0x30e   :  { %310 = vmax.xlane.f32.xlu0 %v309_v62 }
 0x39a   :  { %v314_v63 = vpop.xlane.xlu1 %313 }
 0x39b   :  { %v316_v2 = vsub.f32 %v1975_v59, %v314_v63  ;;  %v311_v3 = vpop.xlane.xlu0 %310 }
 0x39c   :  { %v315_v4 = vsub.f32 %v300_v60, %v311_v3 }
 0x39d   :  { %v319_v5 = vmul.f32 1.442695, %v316_v2 }
 0x39e   :  { %v317_v6 = vmul.f32 1.442695, %v315_v4 }
 0x39f   :  { %2356 = vpow2.f32 %v319_v5 }
 0x3a0   :  { %2358 = vpow2.f32 %v317_v6 }
 0x3a9   :  { %v2357_v7 = vpop.eup %2356 }
 0x3aa   :  { %v2359_v8 = vpop.eup %2358  ;;  %v324_v9 = vsel %vm215_vm0, %v2357_v7, 0.0 }
 0x3ab   :  { %325 = vadd.xlane.f32.xlu1 %v324_v9  ;;  %v321_v10 = vsel %vm215_vm0, %v2359_v8, 0.0 }
 0x3ac   :  { %322 = vadd.xlane.f32.xlu0 %v321_v10 }
 0x3bc   :  { %2328 = vrot.lane.b32.xlu1 %v2327_v11, %s2458_s14 }
 0x3c0   :  { %2333 = vrot.lane.b32.xlu1 %v2656_v12, %s2462_s8 }
 0x3c2   :  { %2323 = vrot.lane.b32.xlu0 %v2656_v12, %s2458_s14 }
 0x3c4   :  { %2338 = vrot.lane.b32.xlu1 %v2327_v11, %s2462_s8 }
 0x3c6   :  { %424 = vrot.lane.b32.xlu0 %v194_v58, %s2462_s8 }
 0x3c8   :  { %426 = vrot.lane.b32.xlu1 %v1964_v57, %s2462_s8  ;;  %v214_v57 = vld [vmem:[%s2962_s3 + $0x38] sm:$0xff] }
 0x3c9   :  { %v2107_v58 = vpack.c.bf16 %v214_v57, %v213_v55 }
 0x3cb   :  { %2108 = vmatprep.subr.bf16.mxu0 %v2107_v58 }
 0x3cc   :  { %2110 = vmatpush3.bf16.msra.mxu0 %v2107_v58 }
 0x438   :  { %v326_v13 = vpop.xlane.xlu1 %325 }
 0x439   :  { %v323_v14 = vpop.xlane.xlu0 %322 }
 0x43a   :  { %2360 = vrcp.f32 %v323_v14  ;;  %v209_v14 = vld [vmem:[%s2962_s3 + $0x10] sm:$0xff] }
 0x43b   :  { %2362 = vrcp.f32 %v326_v13 }
 0x43c   :  { %v2329_v15 = vpop.permute.xlu1 %2328 }
 0x43d   :  { %v2331_v16 = vunpack.i.h.bf16 %v2329_v15  ;;  %v2330_v17 = vunpack.i.l.bf16 %v2329_v15  ;;  %v2324_v18 = vpop.permute.xlu0 %2323  ;;  %v210_v15 = vld [vmem:[%s2962_s3 + $0x18] sm:$0xff] }
 0x43e   :  { %v2326_v19 = vunpack.i.h.bf16 %v2324_v18  ;;  %v2325_v20 = vunpack.i.l.bf16 %v2324_v18  ;;  %v2115_v18 = vpack.c.bf16 %v210_v15, %v209_v14  ;;  %v907_v15 = vld [vmem:[#allocation2 + $0x208] sm:$0xff] }
 0x43f   :  { %v2079_v21 = vpack.c.bf16 %v2331_v16, %v2330_v17 }
 0x440   :  { %v2075_v22 = vpack.c.bf16 %v2326_v19, %v2325_v20  ;;  %v2334_v23 = vpop.permute.xlu1 %2333 }
 0x441   :  { %v2336_v24 = vunpack.i.h.bf16 %v2334_v23  ;;  %v2335_v25 = vunpack.i.l.bf16 %v2334_v23  ;;  %v425_v34 = vpop.permute.xlu0 %424  ;;  %v843_v23 = vld [vmem:[#allocation2 + $0x8] sm:$0xff] }
 0x442   :  { %2076 = vmatprep.subr.bf16.mxu1 %v2075_v22 }
 0x443   :  { %2078 = vmatpush3.bf16.msra.mxu1 %v2075_v22  ;;  %v2083_v27 = vpack.c.bf16 %v2336_v24, %v2335_v25  ;;  %v851_v24 = vld [vmem:[#allocation2 + $0x48] sm:$0xff]  ;;  %v845_v25 = vld [vmem:[#allocation2 + $0x18] sm:$0xff] }
 0x444   :  { %v2361_v26 = vpop.eup %2360  ;;  %2080 = vmatprep.subr.bf16.mxu1 %v2079_v21  ;;  %v2339_v31 = vpop.permute.xlu1 %2338 }
 0x445   :  { %v2363_v28 = vpop.eup %2362  ;;  %v329_v29 = vmul.f32 %v2361_v26, %v2359_v8  ;;  %v2341_v32 = vunpack.i.h.bf16 %v2339_v31  ;;  %v2340_v33 = vunpack.i.l.bf16 %v2339_v31  ;;  %v2119_v26 = vpack.c.bf16 %v851_v24, %v843_v23  ;;  %v914_v23 = vld [vmem:[#allocation2 + $0x240] sm:$0xff] }
 0x446   :  { %v330_v30 = vmul.f32 %v2363_v28, %v2357_v7  ;;  %v842_v28 = vld [vmem:[#allocation2] sm:$0xff] }
 0x447   :  { %2082 = vmatpush3.bf16.msra.mxu1 %v2079_v21  ;;  %1984 = vmatprep.mubr.msk.f32.mxu1 %vm215_vm0, %v329_v29  ;;  %v2089_v35 = vpack.c.bf16 %v2341_v32, %v2340_v33  ;;  %v850_v29 = vld [vmem:[#allocation2 + $0x40] sm:$0xff]  ;;  %v844_v32 = vld [vmem:[#allocation2 + $0x10] sm:$0xff]  ;;  %v859_v33 = vld [vmem:[#allocation2 + $0x88] sm:$0xff] }
 0x448   :  { %2085 = vmatprep.subr.msk.bf16.mxu1 %vm2628_vm1, %v2083_v27  ;;  %v427_v36 = vpop.permute.xlu1 %426  ;;  %v2121_v31 = vpack.c.bf16 %v850_v29, %v842_v28  ;;  %v923_v29 = vld [vmem:[#allocation2 + $0x288] sm:$0xff] }
 0x44a   :  { %1985 = vmatmul.mubr.msk.f32.vlgmr.msra.gmra.mrb[2].mxu1 %vm215_vm0, %v330_v30 }
 0x44b   :  { %1995 = vmatprep.mubr.msk.f32.mxu1 %vm215_vm0, %v425_v34 }
 0x450   :  { %2088 = vmatpush3.bf16.xpose.msk.msra.mxu1 %vm2628_vm1, %v2083_v27  ;;  %v853_v27 = vld [vmem:[#allocation2 + $0x58] sm:$0xff] }
 0x451   :  { %2091 = vmatprep.subr.msk.bf16.mxu1 %vm2628_vm1, %v2089_v35  ;;  %v2151_v30 = vpack.c.bf16 %v853_v27, %v845_v25  ;;  %v916_v27 = vld [vmem:[#allocation2 + $0x250] sm:$0xff] }
 0x458   :  { %2094 = vmatpush3.bf16.xpose.msk.msra.mxu1 %vm2628_vm1, %v2089_v35  ;;  %v861_v35 = vld [vmem:[#allocation2 + $0x98] sm:$0xff] }
 0x45f   :  { %1996 = vmatmul.mubr.msk.f32.vlgmr.msra.gmra.mrb[4].mxu1 %vm215_vm0, %v427_v36  ;;  %v869_v36 = vld [vmem:[#allocation2 + $0xd8] sm:$0xff] }
 0x51d   :  { %v2673_v37 = vpop.f32.mrb[2].mxu1 }
 0x51e   :  { %v2675_v39 = vpop.f32.mrb[3].mxu1 }
 0x532   :  { %v1997_v40 = vpop.f32.mrb[4].mxu1 }
 0x533   :  { %v514_v41 = vpop.f32.mrb[5].mxu1  ;;  %v526_v42 = vsel %vm215_vm0, %v1997_v40, -inf }
 0x534   :  { %527 = vmax.xlane.f32.xlu1 %v526_v42  ;;  %v523_v43 = vsel %vm215_vm0, %v514_v41, -inf  ;;  %v860_v42 = vld [vmem:[#allocation2 + $0x90] sm:$0xff] }
 0x535   :  { %524 = vmax.xlane.f32.xlu0 %v523_v43 }
 0x545   :  { %2348 = vrot.lane.b32.xlu1 %v2327_v11, %s2463_s9  ;;  %v207_v11 = vld [vmem:[%s2962_s3] sm:$0xff] }
 0x5c1   :  { %v528_v44 = vpop.xlane.xlu1 %527 }
 0x5c2   :  { %v530_v38 = vsub.f32 %v1997_v40, %v528_v44  ;;  %v525_v45 = vpop.xlane.xlu0 %524  ;;  %v858_v40 = vld [vmem:[#allocation2 + $0x80] sm:$0xff]  ;;  %v868_v44 = vld [vmem:[#allocation2 + $0xd0] sm:$0xff] }
 0x5c3   :  { %v529_v46 = vsub.f32 %v514_v41, %v525_v45  ;;  %v866_v41 = vld [vmem:[#allocation2 + $0xc0] sm:$0xff]  ;;  %v883_v45 = vld [vmem:[#allocation2 + $0x148] sm:$0xff] }
 0x5c4   :  { %v533_v47 = vmul.f32 1.442695, %v530_v38  ;;  %v2125_v43 = vpack.c.bf16 %v866_v41, %v858_v40  ;;  %v875_v38 = vld [vmem:[#allocation2 + $0x108] sm:$0xff]  ;;  %v2464_v40 = vmov 0.0  }
 0x5c5   :  { %v531_v48 = vmul.f32 1.442695, %v529_v46  ;;  %v2349_v61 = vpop.permute.xlu1 %2348  ;;  %v2157_v46 = vpack.c.bf16 %v868_v44, %v860_v42  ;;  %v947_v42 = vld [vmem:[#allocation2 + $0x348] sm:$0xff]  ;;  %v949_v44 = vld [vmem:[#allocation2 + $0x358] sm:$0xff] }
 0x5c6   :  { %2364 = vpow2.f32 %v533_v47  ;;  %v2351_v62 = vunpack.i.h.bf16 %v2349_v61  ;;  %v2350_v63 = vunpack.i.l.bf16 %v2349_v61  ;;  %v2127_v47 = vpack.c.bf16 %v883_v45, %v875_v38 }
 0x5c7   :  { %2366 = vpow2.f32 %v531_v48  ;;  %v877_v48 = vld [vmem:[#allocation2 + $0x118] sm:$0xff] }
 0x5c8   :  { %v2099_v6 = vpack.c.bf16 %v2351_v62, %v2350_v63 }
 0x5d0   :  { %v2365_v49 = vpop.eup %2364 }
 0x5d1   :  { %v538_v50 = vsel %vm215_vm0, %v2365_v49, 0.0  ;;  %v2367_v51 = vpop.eup %2366 }
 0x5d2   :  { %539 = vadd.xlane.f32.xlu0 %v538_v50  ;;  %v535_v52 = vsel %vm215_vm0, %v2367_v51, 0.0  ;;  %v874_v50 = vld [vmem:[#allocation2 + $0x100] sm:$0xff] }
 0x5d6   :  { %536 = vadd.xlane.f32.xlu0 %v535_v52  ;;  %v882_v52 = vld [vmem:[#allocation2 + $0x140] sm:$0xff] }
 0x5d7   :  { %v2129_v55 = vpack.c.bf16 %v882_v52, %v874_v50  ;;  %v948_v50 = vld [vmem:[#allocation2 + $0x350] sm:$0xff]  ;;  %v963_v52 = vld [vmem:[#allocation2 + $0x3c8] sm:$0xff] }
 0x5ec   :  { %2343 = vrot.lane.b32.xlu0 %v2656_v12, %s2463_s9  ;;  %v208_v12 = vld [vmem:[%s2962_s3 + $0x8] sm:$0xff] }
 0x5ed   :  { %v2111_v13 = vpack.c.bf16 %v208_v12, %v207_v11  ;;  %v892_v12 = vld [vmem:[#allocation2 + $0x190] sm:$0xff] }
 0x5ef   :  { %2112 = vmatprep.subr.bf16.mxu0 %v2111_v13 }
 0x65f   :  { %v540_v59 = vpop.xlane.xlu0 %539 }
 0x663   :  { %v537_v60 = vpop.xlane.xlu0 %536 }
 0x664   :  { %2368 = vrcp.f32 %v537_v60 }
 0x665   :  { %2370 = vrcp.f32 %v540_v59 }
 0x667   :  { %v2344_v2 = vpop.permute.xlu0 %2343 }
 0x668   :  { %v2346_v3 = vunpack.i.h.bf16 %v2344_v2  ;;  %v2345_v4 = vunpack.i.l.bf16 %v2344_v2 }
 0x66a   :  { %v2095_v5 = vpack.c.bf16 %v2346_v3, %v2345_v4  ;;  %v891_v3 = vld [vmem:[#allocation2 + $0x188] sm:$0xff] }
 0x66b   :  { %v899_v4 = vld [vmem:[#allocation2 + $0x1c8] sm:$0xff] }
 0x66c   :  { %2096 = vmatprep.subr.bf16.mxu1 %v2095_v5 }
 0x66d   :  { %2098 = vmatpush3.bf16.msra.mxu1 %v2095_v5  ;;  %v893_v5 = vld [vmem:[#allocation2 + $0x198] sm:$0xff] }
 0x66e   :  { %v2369_v7 = vpop.eup %2368  ;;  %2100 = vmatprep.subr.bf16.mxu1 %v2099_v6 }
 0x66f   :  { %v2371_v8 = vpop.eup %2370  ;;  %v543_v9 = vmul.f32 %v2369_v7, %v2367_v51  ;;  %v901_v7 = vld [vmem:[#allocation2 + $0x1d8] sm:$0xff] }
 0x670   :  { %v544_v10 = vmul.f32 %v2371_v8, %v2365_v49  ;;  %v885_v49 = vld [vmem:[#allocation2 + $0x158] sm:$0xff]  ;;  %v890_v8 = vld [vmem:[#allocation2 + $0x180] sm:$0xff] }
 0x671   :  { %2102 = vmatpush3.bf16.msra.mxu1 %v2099_v6  ;;  %2006 = vmatprep.mubr.msk.f32.mxu1 %vm215_vm0, %v543_v9  ;;  %v2159_v51 = vpack.c.bf16 %v885_v49, %v877_v48  ;;  %v2131_v6 = vpack.c.bf16 %v899_v4, %v891_v3  ;;  %v898_v9 = vld [vmem:[#allocation2 + $0x1c0] sm:$0xff]  ;;  %v940_v48 = vld [vmem:[#allocation2 + $0x310] sm:$0xff]  ;;  %v855_v3 = vld [vmem:[#allocation2 + $0x68] sm:$0xff] }
 0x672   :  { %2120 = vmatprep.subr.bf16.mxu1 %v2119_v26  ;;  %v2133_v11 = vpack.c.bf16 %v898_v9, %v890_v8  ;;  %v908_v26 = vld [vmem:[#allocation2 + $0x210] sm:$0xff]  ;;  %v2177_v53 = vpack.c.bf16 %v948_v50, %v940_v48  ;;  %v849_v4 = vld [vmem:[#allocation2 + $0x38] sm:$0xff] }
 0x673   :  { %v2169_v28 = vpack.c.bf16 %v916_v27, %v908_v26  ;;  %v1798_v27 = vld [vmem:[%s2970_s11] ss:$0 sm:$0xff] }
 0x674   :  { %2007 = vmatmul.mubr.msk.f32.vlgmr.msra.gmra.mrb[6].mxu1 %vm215_vm0, %v544_v10  ;;  %v2163_v10 = vpack.c.bf16 %v901_v7, %v893_v5 }
 0x675   :  { %2122 = vmatpush1.bf16.msra.mxu1 %v2121_v31  ;;  %v925_v31 = vld [vmem:[#allocation2 + $0x298] sm:$0xff]  ;;  %1076 = vmatprep.mubr.f32.mxu1 %v2464_v40 }
 0x747   :  { %v2008_v16 = vpop.f32.mrb[6].mxu1 }
 0x748   :  { %v629_v17 = vpop.f32.mrb[7].mxu1 }
 0x749   :  { %2017 = vmatprep.mubr.msk.f32.mxu0 %vm215_vm0, %v629_v17  ;;  %v909_v17 = vld [vmem:[#allocation2 + $0x218] sm:$0xff] }
 0x74a   :  { %2018 = vmatmul.mubr.msk.f32.vlgmr.msra.gmra.mrb[2].mxu0 %vm215_vm0, %v2008_v16  ;;  %v915_v16 = vld [vmem:[#allocation2 + $0x248] sm:$0xff] }
 0x74b   :  { %2114 = vmatpush3.bf16.msra.mxu0 %v2111_v13  ;;  %2028 = vmatprep.mubr.msk.f32.mxu0 %vm215_vm0, %v2675_v39  ;;  %v2155_v39 = vpack.c.bf16 %v869_v36, %v861_v35  ;;  %v900_v13 = vld [vmem:[#allocation2 + $0x1d0] sm:$0xff] }
 0x74c   :  { %2116 = vmatprep.subr.bf16.mxu0 %v2115_v18  ;;  %v2165_v14 = vpack.c.bf16 %v900_v13, %v892_v12  ;;  %v924_v36 = vld [vmem:[#allocation2 + $0x290] sm:$0xff] }
 0x74f   :  { %2118 = vmatpush3.bf16.msra.mxu0 %v2115_v18  ;;  %v2135_v18 = vpack.c.bf16 %v915_v16, %v907_v15 }
 0x750   :  { %2152 = vmatprep.subr.bf16.mxu0 %v2151_v30  ;;  %v931_v30 = vld [vmem:[#allocation2 + $0x2c8] sm:$0xff] }
 0x752   :  { %2029 = vmatmul.mubr.msk.f32.vlgmr.msra.gmra.mrb[2].mxu0 %vm215_vm0, %v2673_v37 }
 0x753   :  { %1153 = vmatprep.mubr.f32.mxu0 %v2464_v40 }
 0x825   :  { %v2030_v19 = vpop.f32.mrb[2].mxu0 }
 0x826   :  { %v2715_v20 = vadd.f32 %v2030_v19, %v2564_v1  ;;  %v791_v21 = vpop.f32.mrb[3].mxu0  ;;  %v852_v1 = vld [vmem:[#allocation2 + $0x50] sm:$0xff]  ;;  %v917_v19 = vld [vmem:[#allocation2 + $0x258] sm:$0xff] }
 0x827   :  { %v2718_v22 = vadd.f32 %v791_v21, %v2558_v0  ;;  %v2153_v34 = vpack.c.bf16 %v852_v1, %v844_v32  ;;  %v867_v0 = vld [vmem:[#allocation2 + $0xc8] sm:$0xff]  ;;  %v906_v21 = vld [vmem:[#allocation2 + $0x200] sm:$0xff]  ;;  %v2167_v24 = vpack.c.bf16 %v917_v19, %v909_v17  ;;  %v2139_v32 = vpack.c.bf16 %v931_v30, %v923_v29  ;;  %v933_v1 = vld [vmem:[#allocation2 + $0x2d8] sm:$0xff] }
 0x828   :  { %806 = vadd.xlane.f32.xlu0 %v2715_v20  ;;  %v2123_v37 = vpack.c.bf16 %v867_v0, %v859_v33  ;;  %v2137_v25 = vpack.c.bf16 %v914_v23, %v906_v21  ;;  %v922_v33 = vld [vmem:[#allocation2 + $0x280] sm:$0xff]  ;;  %v2171_v0 = vpack.c.bf16 %v933_v1, %v925_v31  ;;  %v871_v30 = vld [vmem:[#allocation2 + $0xe8] sm:$0xff]  ;;  %v865_v31 = vld [vmem:[#allocation2 + $0xb8] sm:$0xff] }
 0x829   :  { %804 = vadd.xlane.f32.xlu1 %v2718_v22  ;;  %2154 = vmatpush1.bf16.msra.mxu0 %v2153_v34  ;;  %v930_v34 = vld [vmem:[#allocation2 + $0x2c0] sm:$0xff] }
 0x82a   :  { %2124 = vmatprep.subr.bf16.mxu1 %v2123_v37  ;;  %2156 = vmatprep.subr.bf16.mxu0 %v2155_v39  ;;  %v2141_v35 = vpack.c.bf16 %v930_v34, %v922_v33  ;;  %v932_v37 = vld [vmem:[#allocation2 + $0x2d0] sm:$0xff]  ;;  %v939_v39 = vld [vmem:[#allocation2 + $0x308] sm:$0xff]  ;;  %v846_v19 = vld [vmem:[#allocation2 + $0x20] sm:$0xff] }
 0x82b   :  { %2126 = vmatpush1.bf16.msra.mxu1 %v2125_v43  ;;  %v2173_v41 = vpack.c.bf16 %v932_v37, %v924_v36  ;;  %v941_v43 = vld [vmem:[#allocation2 + $0x318] sm:$0xff]  ;;  %v2143_v38 = vpack.c.bf16 %v947_v42, %v939_v39  ;;  %v854_v23 = vld [vmem:[#allocation2 + $0x60] sm:$0xff]  ;;  %v864_v36 = vld [vmem:[#allocation2 + $0xb0] sm:$0xff] }
 0x82c   :  { %2128 = vmatprep.subr.bf16.mxu1 %v2127_v47  ;;  %v2175_v45 = vpack.c.bf16 %v949_v44, %v941_v43  ;;  %v946_v47 = vld [vmem:[#allocation2 + $0x340] sm:$0xff]  ;;  %v2185_v1 = vpack.c.bf16 %v854_v23, %v846_v19  ;;  %v872_v37 = vld [vmem:[#allocation2 + $0xf0] sm:$0xff]  ;;  %v879_v39 = vld [vmem:[#allocation2 + $0x128] sm:$0xff] }
 0x82d   :  { %2158 = vmatpush1.bf16.msra.mxu0 %v2157_v46  ;;  %v938_v46 = vld [vmem:[#allocation2 + $0x300] sm:$0xff]  ;;  %v887_v42 = vld [vmem:[#allocation2 + $0x168] sm:$0xff]  ;;  %v881_v43 = vld [vmem:[#allocation2 + $0x138] sm:$0xff] }
 0x82e   :  { %2160 = vmatprep.subr.bf16.mxu0 %v2159_v51  ;;  %v2145_v49 = vpack.c.bf16 %v946_v47, %v938_v46  ;;  %v955_v51 = vld [vmem:[#allocation2 + $0x388] sm:$0xff]  ;;  %v862_v34 = vld [vmem:[#allocation2 + $0xa0] sm:$0xff]  ;;  %v889_v44 = vld [vmem:[#allocation2 + $0x178] sm:$0xff] }
 0x82f   :  { %2130 = vmatpush1.bf16.msra.mxu1 %v2129_v55  ;;  %v2147_v54 = vpack.c.bf16 %v963_v52, %v955_v51  ;;  %v957_v55 = vld [vmem:[#allocation2 + $0x398] sm:$0xff]  ;;  %v878_v46 = vld [vmem:[#allocation2 + $0x120] sm:$0xff]  ;;  %v2223_v50 = vpack.c.bf16 %v889_v44, %v881_v43  ;;  %v880_v51 = vld [vmem:[#allocation2 + $0x130] sm:$0xff] }
 0x830   :  { %2132 = vmatprep.subr.bf16.mxu1 %v2131_v6  ;;  %v857_v6 = vld [vmem:[#allocation2 + $0x78] sm:$0xff]  ;;  %v886_v47 = vld [vmem:[#allocation2 + $0x160] sm:$0xff]  ;;  %v888_v52 = vld [vmem:[#allocation2 + $0x170] sm:$0xff] }
 0x831   :  { %2162 = vmatpush1.bf16.msra.mxu0 %v2161_v56  ;;  %v965_v56 = vld [vmem:[#allocation2 + $0x3d8] sm:$0xff]  ;;  %v2215_v9 = vpack.c.bf16 %v857_v6, %v849_v4  ;;  %v904_v4 = vld [vmem:[#allocation2 + $0x1f0] sm:$0xff]  ;;  %v919_v6 = vld [vmem:[#allocation2 + $0x268] sm:$0xff] }
 0x832   :  { %2164 = vmatprep.subr.bf16.mxu0 %v2163_v10  ;;  %v929_v19 = vld [vmem:[#allocation2 + $0x2b8] sm:$0xff]  ;;  %v967_v43 = vld [vmem:[#allocation2 + $0x3e8] sm:$0xff] }
 0x833   :  { %2134 = vmatpush1.bf16.msra.mxu1 %v2133_v11  ;;  %v961_v44 = vld [vmem:[#allocation2 + $0x3b8] sm:$0xff] }
 0x834   :  { %2136 = vmatprep.subr.bf16.mxu1 %v2135_v18  ;;  %v1797_v18 = vld [vmem:[%s2969_s10] ss:$0 sm:$0xff] }
 0x835   :  { %2166 = vmatpush1.bf16.msra.mxu0 %v2165_v14 }
 0x836   :  { %2168 = vmatprep.subr.bf16.mxu0 %v2167_v24  ;;  %v848_v24 = vld [vmem:[#allocation2 + $0x30] sm:$0xff] }
 0x837   :  { %2138 = vmatpush1.bf16.msra.mxu1 %v2137_v25  ;;  %v856_v25 = vld [vmem:[#allocation2 + $0x70] sm:$0xff] }
 0x838   :  { %2140 = vmatprep.subr.bf16.mxu1 %v2139_v32  ;;  %v873_v32 = vld [vmem:[#allocation2 + $0xf8] sm:$0xff]  ;;  %v2217_v33 = vpack.c.bf16 %v856_v25, %v848_v24  ;;  %v926_v25 = vld [vmem:[#allocation2 + $0x2a0] sm:$0xff] }
 0x839   :  { %2170 = vmatpush1.bf16.msra.mxu0 %v2169_v28  ;;  %v863_v28 = vld [vmem:[#allocation2 + $0xa8] sm:$0xff] }
 0x83a   :  { %2172 = vmatprep.subr.bf16.mxu0 %v2171_v0  ;;  %v870_v0 = vld [vmem:[#allocation2 + $0xe0] sm:$0xff] }
 0x83b   :  { %2142 = vmatpush1.bf16.msra.mxu1 %v2141_v35 }
 0x83c   :  { %2144 = vmatprep.subr.bf16.mxu1 %v2143_v38  ;;  %v2189_v38 = vpack.c.bf16 %v870_v0, %v862_v34 }
 0x83d   :  { %2174 = vmatpush1.bf16.msra.mxu0 %v2173_v41  ;;  %v2219_v41 = vpack.c.bf16 %v873_v32, %v865_v31  ;;  %v943_v31 = vld [vmem:[#allocation2 + $0x328] sm:$0xff] }
 0x83e   :  { %2176 = vmatprep.subr.bf16.mxu0 %v2175_v45  ;;  %v2221_v45 = vpack.c.bf16 %v872_v37, %v864_v36  ;;  %v951_v32 = vld [vmem:[#allocation2 + $0x368] sm:$0xff]  ;;  %v950_v36 = vld [vmem:[#allocation2 + $0x360] sm:$0xff] }
 0x83f   :  { %2146 = vmatpush1.bf16.msra.mxu1 %v2145_v49  ;;  %v2191_v49 = vpack.c.bf16 %v887_v42, %v879_v39  ;;  %v2207_v37 = vpack.c.bf16 %v951_v32, %v943_v31  ;;  %v959_v42 = vld [vmem:[#allocation2 + $0x3a8] sm:$0xff]  ;;  %v1566_v31 = vld [vmem:[#allocation4 + $0xb0] sm:$0xff]  ;;  %v1567_v32 = vld [vmem:[#allocation4 + $0xb8] sm:$0xff] }
 0x840   :  { %2148 = vmatprep.subr.bf16.mxu1 %v2147_v54  ;;  %v903_v54 = vld [vmem:[#allocation2 + $0x1e8] sm:$0xff] }
 0x841   :  { %2178 = vmatpush1.bf16.msra.mxu0 %v2177_v53  ;;  %v895_v53 = vld [vmem:[#allocation2 + $0x1a8] sm:$0xff] }
 0x8b5   :  { %v807_v57 = vpop.xlane.xlu0 %806 }
 0x8b6   :  { %v809_v58 = vmul.f32 0.0078125, %v807_v57  ;;  %v805_v59 = vpop.xlane.xlu1 %804  ;;  %v954_v57 = vld [vmem:[#allocation2 + $0x380] sm:$0xff] }
 0x8b7   :  { %v808_v60 = vmul.f32 0.0078125, %v805_v59  ;;  %v962_v59 = vld [vmem:[#allocation2 + $0x3c0] sm:$0xff] }
 0x8b8   :  { %v2723_v61 = vsub.f32 %v2715_v20, %v809_v58  ;;  %v2179_v58 = vpack.c.bf16 %v965_v56, %v957_v55  ;;  %v2149_v5 = vpack.c.bf16 %v962_v59, %v954_v57  ;;  %v897_v55 = vld [vmem:[#allocation2 + $0x1b8] sm:$0xff]  ;;  %v2193_v57 = vpack.c.bf16 %v886_v47, %v878_v46  ;;  %v894_v59 = vld [vmem:[#allocation2 + $0x1a0] sm:$0xff] }
 0x8b9   :  { %v2726_v62 = vsub.f32 %v2718_v22, %v808_v60  ;;  %v956_v60 = vld [vmem:[#allocation2 + $0x390] sm:$0xff]  ;;  %v905_v56 = vld [vmem:[#allocation2 + $0x1f8] sm:$0xff]  ;;  %v958_v47 = vld [vmem:[#allocation2 + $0x3a0] sm:$0xff] }
 0x8ba   :  { %v813_v63 = vmul.f32 %v2723_v61, %v2723_v61  ;;  %2180 = vmatprep.subr.bf16.mxu0 %v2179_v58  ;;  %2150 = vmatpush1.bf16.msra.mxu1 %v2149_v5  ;;  %v2225_v58 = vpack.c.bf16 %v888_v52, %v880_v51  ;;  %v911_v5 = vld [vmem:[#allocation2 + $0x228] sm:$0xff]  ;;  %v966_v51 = vld [vmem:[#allocation2 + $0x3e0] sm:$0xff]  ;;  %v960_v52 = vld [vmem:[#allocation2 + $0x3b0] sm:$0xff] }
 0x8bb   :  { %v812_v2 = vmul.f32 %v2726_v62, %v2726_v62 }
 0x8bc   :  { %816 = vadd.xlane.f32.xlu1 %v813_v63  ;;  %v964_v63 = vld [vmem:[#allocation2 + $0x3d0] sm:$0xff] }
 0x8bd   :  { %814 = vadd.xlane.f32.xlu0 %v812_v2  ;;  %v847_v2 = vld [vmem:[#allocation2 + $0x28] sm:$0xff]  ;;  %v2181_v7 = vpack.c.bf16 %v964_v63, %v956_v60  ;;  %v902_v60 = vld [vmem:[#allocation2 + $0x1e0] sm:$0xff]  ;;  %v2195_v63 = vpack.c.bf16 %v903_v54, %v895_v53  ;;  %v968_v53 = vld [vmem:[#allocation2 + $0x3f0] sm:$0xff]  ;;  %v2213_v54 = vpack.c.bf16 %v966_v51, %v958_v47 }
 0x8be   :  { %v2183_v8 = vpack.c.bf16 %v855_v3, %v847_v2  ;;  %v2227_v2 = vpack.c.bf16 %v905_v56, %v897_v55  ;;  %v896_v3 = vld [vmem:[#allocation2 + $0x1b0] sm:$0xff]  ;;  %v2245_v55 = vpack.c.bf16 %v968_v53, %v960_v52  ;;  %v1560_v56 = vld [vmem:[#allocation4 + $0x80] sm:$0xff]  ;;  %v1553_v47 = vld [vmem:[#allocation4 + $0x48] sm:$0xff] }
 0x8bf   :  { %2182 = vmatpush1.bf16.msra.mxu0 %v2181_v7  ;;  %v913_v7 = vld [vmem:[#allocation2 + $0x238] sm:$0xff]  ;;  %v1584_v51 = vld [vmem:[#allocation4 + $0x140] sm:$0xff]  ;;  %v1585_v52 = vld [vmem:[#allocation4 + $0x148] sm:$0xff] }
 0x8c0   :  { %2184 = vmatprep.subr.bf16.mxu1 %v2183_v8  ;;  %2216 = vmatprep.subr.bf16.mxu0 %v2215_v9  ;;  %v921_v8 = vld [vmem:[#allocation2 + $0x278] sm:$0xff]  ;;  %v2197_v9 = vpack.c.bf16 %v902_v60, %v894_v59  ;;  %v1593_v60 = vld [vmem:[#allocation4 + $0x188] sm:$0xff]  ;;  %v2297_v53 = vpack.c.bf16 %v1585_v52, %v1584_v51 }
 0x949   :  { %v817_v10 = vpop.xlane.xlu1 %816 }
 0x94a   :  { %v819_v11 = vmul.f32 0.0078125, %v817_v10  ;;  %v815_v12 = vpop.xlane.xlu0 %814  ;;  %v2229_v10 = vpack.c.bf16 %v904_v4, %v896_v3 }
 0x94b   :  { %v818_v13 = vmul.f32 0.0078125, %v815_v12  ;;  %v918_v12 = vld [vmem:[#allocation2 + $0x260] sm:$0xff] }
 0x94c   :  { %v821_v14 = vadd.f32 1e-05, %v819_v11  ;;  %v910_v11 = vld [vmem:[#allocation2 + $0x220] sm:$0xff] }
 0x94d   :  { %v820_v15 = vadd.f32 1e-05, %v818_v13  ;;  %v2199_v13 = vpack.c.bf16 %v919_v6, %v911_v5  ;;  %v2201_v23 = vpack.c.bf16 %v918_v12, %v910_v11  ;;  %v1576_v5 = vld [vmem:[#allocation4 + $0x100] sm:$0xff]  ;;  %v1577_v6 = vld [vmem:[#allocation4 + $0x108] sm:$0xff]  ;;  %v1547_v11 = vld [vmem:[#allocation4 + $0x18] sm:$0xff] }
 0x94e   :  { %2372 = vrsqrt.f32 %v821_v14  ;;  %v2231_v14 = vpack.c.bf16 %v921_v8, %v913_v7  ;;  %v1563_v7 = vld [vmem:[#allocation4 + $0x98] sm:$0xff]  ;;  %v1594_v8 = vld [vmem:[#allocation4 + $0x190] sm:$0xff] }
 0x94f   :  { %2374 = vrsqrt.f32 %v820_v15  ;;  %v912_v15 = vld [vmem:[#allocation2 + $0x230] sm:$0xff] }
 0x958   :  { %v2373_v16 = vpop.eup %2372 }
 0x959   :  { %v2375_v17 = vpop.eup %2374  ;;  %v825_v26 = vmul.f32 %v2373_v16, %v2723_v61  ;;  %v2187_v61 = vpack.c.bf16 %v871_v30, %v863_v28  ;;  %v920_v16 = vld [vmem:[#allocation2 + $0x270] sm:$0xff] }
 0x95a   :  { %v824_v21 = vmul.f32 %v2375_v17, %v2726_v62  ;;  %v927_v17 = vld [vmem:[#allocation2 + $0x2a8] sm:$0xff]  ;;  %v2233_v24 = vpack.c.bf16 %v920_v16, %v912_v15  ;;  %v936_v30 = vld [vmem:[#allocation2 + $0x2f0] sm:$0xff]  ;;  %v1579_v15 = vld [vmem:[#allocation4 + $0x118] sm:$0xff] }
 0x95b   :  { %v833_v62 = vmul.f32 %v1797_v18, %v825_v26  ;;  %v934_v26 = vld [vmem:[#allocation2 + $0x2e0] sm:$0xff] }
 0x95c   :  { %v832_v29 = vmul.f32 %v1797_v18, %v824_v21  ;;  %v935_v18 = vld [vmem:[#allocation2 + $0x2e8] sm:$0xff]  ;;  %v937_v21 = vld [vmem:[#allocation2 + $0x2f8] sm:$0xff]  ;;  %v2205_v34 = vpack.c.bf16 %v934_v26, %v926_v25 }
 0x95d   :  { %v2748_v48 = vadd.f32 %v1798_v27, %v833_v62  ;;  %v2235_v28 = vpack.c.bf16 %v937_v21, %v929_v19  ;;  %v942_v62 = vld [vmem:[#allocation2 + $0x320] sm:$0xff]  ;;  %v1549_v25 = vld [vmem:[#allocation4 + $0x28] sm:$0xff] }
 0x95e   :  { %v2742_v35 = vadd.f32 %v1798_v27, %v832_v29  ;;  %v2203_v27 = vpack.c.bf16 %v935_v18, %v927_v17  ;;  %v928_v29 = vld [vmem:[#allocation2 + $0x2b0] sm:$0xff]  ;;  %v1564_v17 = vld [vmem:[#allocation4 + $0xa0] sm:$0xff]  ;;  %v1565_v18 = vld [vmem:[#allocation4 + $0xa8] sm:$0xff] }
 0x95f   :  { %v2237_v0 = vpack.c.bf16 %v936_v30, %v928_v29  ;;  %v1596_v19 = vld [vmem:[#allocation4 + $0x1a0] sm:$0xff]  ;;  %v2255_v21 = vpack.c.bf16 %v1565_v18, %v1564_v17  ;;  %v1581_v29 = vld [vmem:[#allocation4 + $0x128] sm:$0xff]  ;;  %v1606_v17 = vld [vmem:[#allocation4 + $0x1f0] sm:$0xff] }
 0x960   :  { %1077 = vmatmul.mubr.f32.vlgmr.msra.gmra.mrb[8].mxu1 %v2742_v35  ;;  %1154 = vmatmul.mubr.f32.vlgmr.msra.gmra.mrb[4].mxu0 %v2742_v35 }
 0x961   :  { %2186 = vmatpush1.bf16.msra.mxu1 %v2185_v1  ;;  %2218 = vmatpush1.bf16.msra.mxu0 %v2217_v33  ;;  %v945_v1 = vld [vmem:[#allocation2 + $0x338] sm:$0xff] }
 0x962   :  { %1082 = vmatprep.mubr.f32.mxu1 %v2464_v40  ;;  %1159 = vmatprep.mubr.f32.mxu0 %v2464_v40  ;;  %v953_v33 = vld [vmem:[#allocation2 + $0x378] sm:$0xff] }
 0x963   :  { %2188 = vmatprep.subr.bf16.mxu1 %v2187_v61  ;;  %2220 = vmatprep.subr.bf16.mxu0 %v2219_v41  ;;  %v2239_v39 = vpack.c.bf16 %v953_v33, %v945_v1  ;;  %v944_v61 = vld [vmem:[#allocation2 + $0x330] sm:$0xff]  ;;  %v2259_v33 = vpack.c.bf16 %v1567_v32, %v1566_v31 }
 0x964   :  { %1083 = vmatmul.mubr.f32.gmra.mrb[10].mxu1 %v2748_v48  ;;  %1160 = vmatmul.mubr.f32.gmra.mrb[6].mxu0 %v2748_v48  ;;  %v952_v41 = vld [vmem:[#allocation2 + $0x370] sm:$0xff] }
 0x965   :  { %2190 = vmatpush1.bf16.msra.mxu1 %v2189_v38  ;;  %2222 = vmatpush1.bf16.msra.mxu0 %v2221_v45  ;;  %v969_v38 = vld [vmem:[#allocation2 + $0x3f8] sm:$0xff]  ;;  %v2209_v45 = vpack.c.bf16 %v950_v36, %v942_v62  ;;  %v2241_v46 = vpack.c.bf16 %v952_v41, %v944_v61  ;;  %v1598_v1 = vld [vmem:[#allocation4 + $0x1b0] sm:$0xff] }
 0x966   :  { %2192 = vmatprep.subr.bf16.mxu1 %v2191_v49  ;;  %2224 = vmatprep.subr.bf16.mxu0 %v2223_v50  ;;  %v2211_v49 = vpack.c.bf16 %v967_v43, %v959_v42  ;;  %v2243_v50 = vpack.c.bf16 %v969_v38, %v961_v44  ;;  %v1551_v62 = vld [vmem:[#allocation4 + $0x38] sm:$0xff]  ;;  %v1568_v42 = vld [vmem:[#allocation4 + $0xc0] sm:$0xff]  ;;  %v1569_v43 = vld [vmem:[#allocation4 + $0xc8] sm:$0xff] }
 0x967   :  { %1230 = vmatprep.mubr.f32.mxu1 %v2464_v40  ;;  %1307 = vmatprep.mubr.f32.mxu0 %v2464_v40  ;;  %v1583_v61 = vld [vmem:[#allocation4 + $0x138] sm:$0xff]  ;;  %v1600_v44 = vld [vmem:[#allocation4 + $0x1c0] sm:$0xff]  ;;  %v2263_v38 = vpack.c.bf16 %v1569_v43, %v1568_v42 }
 0x968   :  { %v970_v42 = vld [vmem:[%s2964_s5] sm:$0xff] }
 0x969   :  { %2194 = vmatpush1.bf16.msra.mxu1 %v2193_v57  ;;  %2226 = vmatpush1.bf16.msra.mxu0 %v2225_v58  ;;  %v1561_v57 = vld [vmem:[#allocation4 + $0x88] sm:$0xff]  ;;  %v1592_v58 = vld [vmem:[#allocation4 + $0x180] sm:$0xff] }
 0x96a   :  { %2196 = vmatprep.subr.bf16.mxu1 %v2195_v63  ;;  %2228 = vmatprep.subr.bf16.mxu0 %v2227_v2  ;;  %v2247_v59 = vpack.c.bf16 %v1561_v57, %v1560_v56  ;;  %v1544_v63 = vld [vmem:[#allocation4] sm:$0xff]  ;;  %v1545_v2 = vld [vmem:[#allocation4 + $0x8] sm:$0xff]  ;;  %v2279_v3 = vpack.c.bf16 %v1593_v60, %v1592_v58  ;;  %v1602_v56 = vld [vmem:[#allocation4 + $0x1d0] sm:$0xff] }
 0x96b   :  { %v2249_v4 = vpack.c.bf16 %v1545_v2, %v1544_v63  ;;  %v1603_v58 = vld [vmem:[#allocation4 + $0x1d8] sm:$0xff] }
 0x96c   :  { %v1555_v60 = vld [vmem:[#allocation4 + $0x58] sm:$0xff]  ;;  %v2299_v63 = vpack.c.bf16 %v1603_v58, %v1602_v56 }
 0x96d   :  { %2198 = vmatpush1.bf16.msra.mxu1 %v2197_v9  ;;  %2230 = vmatpush1.bf16.msra.mxu0 %v2229_v10  ;;  %v1595_v9 = vld [vmem:[#allocation4 + $0x198] sm:$0xff]  ;;  %v1546_v10 = vld [vmem:[#allocation4 + $0x10] sm:$0xff] }
 0x96e   :  { %2200 = vmatprep.subr.bf16.mxu1 %v2199_v13  ;;  %2232 = vmatprep.subr.bf16.mxu0 %v2231_v14  ;;  %v2283_v12 = vpack.c.bf16 %v1595_v9, %v1594_v8  ;;  %v2253_v13 = vpack.c.bf16 %v1547_v11, %v1546_v10  ;;  %v1578_v14 = vld [vmem:[#allocation4 + $0x110] sm:$0xff]  ;;  %v1605_v8 = vld [vmem:[#allocation4 + $0x1e8] sm:$0xff] }
 0x96f   :  { %v2285_v16 = vpack.c.bf16 %v1579_v15, %v1578_v14  ;;  %v1557_v9 = vld [vmem:[#allocation4 + $0x68] sm:$0xff]  ;;  %v1574_v15 = vld [vmem:[#allocation4 + $0xf0] sm:$0xff] }
 0x971   :  { %2202 = vmatpush1.bf16.msra.mxu1 %v2201_v23  ;;  %2234 = vmatpush1.bf16.msra.mxu0 %v2233_v24  ;;  %v1597_v23 = vld [vmem:[#allocation4 + $0x1a8] sm:$0xff]  ;;  %v1548_v24 = vld [vmem:[#allocation4 + $0x20] sm:$0xff] }
 0x972   :  { %2204 = vmatprep.subr.bf16.mxu1 %v2203_v27  ;;  %2236 = vmatprep.subr.bf16.mxu0 %v2235_v28  ;;  %v2287_v26 = vpack.c.bf16 %v1597_v23, %v1596_v19  ;;  %v2257_v27 = vpack.c.bf16 %v1549_v25, %v1548_v24  ;;  %v1580_v28 = vld [vmem:[#allocation4 + $0x120] sm:$0xff]  ;;  %v1607_v19 = vld [vmem:[#allocation4 + $0x1f8] sm:$0xff] }
 0x973   :  { %v2289_v30 = vpack.c.bf16 %v1581_v29, %v1580_v28  ;;  %v1559_v23 = vld [vmem:[#allocation4 + $0x78] sm:$0xff]  ;;  %v2307_v24 = vpack.c.bf16 %v1607_v19, %v1606_v17 }
 0x975   :  { %2206 = vmatpush1.bf16.msra.mxu1 %v2205_v34  ;;  %2238 = vmatpush1.bf16.msra.mxu0 %v2237_v0  ;;  %v1599_v34 = vld [vmem:[#allocation4 + $0x1b8] sm:$0xff]  ;;  %v1550_v0 = vld [vmem:[#allocation4 + $0x30] sm:$0xff] }
 0x976   :  { %2208 = vmatprep.subr.bf16.mxu1 %v2207_v37  ;;  %2240 = vmatprep.subr.bf16.mxu0 %v2239_v39  ;;  %v2291_v36 = vpack.c.bf16 %v1599_v34, %v1598_v1  ;;  %v2261_v37 = vpack.c.bf16 %v1551_v62, %v1550_v0  ;;  %v1582_v39 = vld [vmem:[#allocation4 + $0x130] sm:$0xff]  ;;  %v972_v62 = vlaneseq }
 0x977   :  { %v2293_v41 = vpack.c.bf16 %v1583_v61, %v1582_v39 }
 0x979   :  { %2210 = vmatpush1.bf16.msra.mxu1 %v2209_v45  ;;  %2242 = vmatpush1.bf16.msra.mxu0 %v2241_v46  ;;  %v1601_v45 = vld [vmem:[#allocation4 + $0x1c8] sm:$0xff]  ;;  %v1552_v46 = vld [vmem:[#allocation4 + $0x40] sm:$0xff] }
 0x97a   :  { %2212 = vmatprep.subr.bf16.mxu1 %v2211_v49  ;;  %2244 = vmatprep.subr.bf16.mxu0 %v2243_v50  ;;  %v2295_v49 = vpack.c.bf16 %v1601_v45, %v1600_v44  ;;  %v2265_v50 = vpack.c.bf16 %v1553_v47, %v1552_v46 }
 0x97d   :  { %2214 = vmatpush1.bf16.msra.mxu1 %v2213_v54  ;;  %2246 = vmatpush1.bf16.msra.mxu0 %v2245_v55  ;;  %v1570_v54 = vld [vmem:[#allocation4 + $0xd0] sm:$0xff]  ;;  %v1571_v55 = vld [vmem:[#allocation4 + $0xd8] sm:$0xff] }
 0x97e   :  { %2248 = vmatprep.subr.bf16.mxu1 %v2247_v59  ;;  %2280 = vmatprep.subr.bf16.mxu0 %v2279_v3  ;;  %v2267_v57 = vpack.c.bf16 %v1571_v55, %v1570_v54  ;;  %v1554_v59 = vld [vmem:[#allocation4 + $0x50] sm:$0xff] }
 0x97f   :  { %v2269_v2 = vpack.c.bf16 %v1555_v60, %v1554_v59  ;;  %v1586_v3 = vld [vmem:[#allocation4 + $0x150] sm:$0xff] }
 0x980   :  { %1231 = vmatmul.mubr.f32.vlgmr.msra.gmra.mrb[12].mxu1 %v2742_v35  ;;  %1308 = vmatmul.mubr.f32.vlgmr.msra.gmra.mrb[8].mxu0 %v2742_v35  ;;  %v2281_v35 = vpack.c.bf16 %v1577_v6, %v1576_v5  ;;  %v1572_v6 = vld [vmem:[#allocation4 + $0xe0] sm:$0xff] }
 0x981   :  { %1236 = vmatprep.mubr.f32.mxu1 %v2464_v40  ;;  %1313 = vmatprep.mubr.f32.mxu0 %v2464_v40  ;;  %v1562_v40 = vld [vmem:[#allocation4 + $0x90] sm:$0xff] }
 0x982   :  { %2250 = vmatpush3.bf16.msra.mxu1 %v2249_v4  ;;  %2282 = vmatpush3.bf16.msra.mxu0 %v2281_v35  ;;  %v1587_v4 = vld [vmem:[#allocation4 + $0x158] sm:$0xff]  ;;  %v1573_v35 = vld [vmem:[#allocation4 + $0xe8] sm:$0xff] }
 0x983   :  { %2284 = vmatprep.subr.bf16.mxu0 %v2283_v12  ;;  %v2301_v5 = vpack.c.bf16 %v1587_v4, %v1586_v3  ;;  %v1588_v12 = vld [vmem:[#allocation4 + $0x160] sm:$0xff] }
 0x984   :  { %1237 = vmatmul.mubr.f32.gmra.mrb[14].mxu1 %v2748_v48  ;;  %1314 = vmatmul.mubr.f32.gmra.mrb[10].mxu0 %v2748_v48  ;;  %v2251_v48 = vpack.c.bf16 %v1563_v7, %v1562_v40  ;;  %v1604_v40 = vld [vmem:[#allocation4 + $0x1e0] sm:$0xff]  ;;  %v2271_v7 = vpack.c.bf16 %v1573_v35, %v1572_v6 }
 0x985   :  { %v2303_v10 = vpack.c.bf16 %v1605_v8, %v1604_v40 }
 0x986   :  { %2252 = vmatprep.subr.bf16.mxu1 %v2251_v48  ;;  %2286 = vmatpush3.bf16.msra.mxu0 %v2285_v16  ;;  %v1556_v48 = vld [vmem:[#allocation4 + $0x60] sm:$0xff]  ;;  %v1575_v16 = vld [vmem:[#allocation4 + $0xf8] sm:$0xff] }
 0x987   :  { %2254 = vmatpush3.bf16.msra.mxu1 %v2253_v13  ;;  %2288 = vmatprep.subr.bf16.mxu0 %v2287_v26  ;;  %v2273_v11 = vpack.c.bf16 %v1557_v9, %v1556_v48  ;;  %v1589_v13 = vld [vmem:[#allocation4 + $0x168] sm:$0xff]  ;;  %v2275_v18 = vpack.c.bf16 %v1575_v16, %v1574_v15  ;;  %v1590_v26 = vld [vmem:[#allocation4 + $0x170] sm:$0xff] }
 0x988   :  { %2256 = vmatprep.subr.bf16.mxu1 %v2255_v21  ;;  %v2305_v14 = vpack.c.bf16 %v1589_v13, %v1588_v12  ;;  %v1558_v21 = vld [vmem:[#allocation4 + $0x70] sm:$0xff] }
 0x989   :  { %v2277_v25 = vpack.c.bf16 %v1559_v23, %v1558_v21 }
 0x98a   :  { %2290 = vmatpush3.bf16.msra.mxu0 %v2289_v30 }
 0x98b   :  { %2258 = vmatpush3.bf16.msra.mxu1 %v2257_v27  ;;  %2292 = vmatprep.subr.bf16.mxu0 %v2291_v36  ;;  %v1591_v27 = vld [vmem:[#allocation4 + $0x178] sm:$0xff]  ;;  %v973_v36 = vshrl.u32 %v972_v62, 7 }
 0x98c   :  { %2260 = vmatprep.subr.bf16.mxu1 %v2259_v33  ;;  %v2309_v28 = vpack.c.bf16 %v1591_v27, %v1590_v26 }
 0x98d   :  { %v998_v39 = vsub.s32 6, %v973_v36  ;;  %v994_v61 = vsub.s32 5, %v973_v36  ;;  %v974_v3 = vsub.s32 0, %v973_v36  ;;  %v982_v6 = vsub.s32 2, %v973_v36 }
 0x98e   :  { %2294 = vmatpush3.bf16.msra.mxu0 %v2293_v41  ;;  %v1002_v41 = vsub.s32 7, %v973_v36 }
 0x98f   :  { %2262 = vmatpush3.bf16.msra.mxu1 %v2261_v37  ;;  %2296 = vmatprep.subr.bf16.mxu0 %v2295_v49  ;;  %v990_v37 = vsub.s32 4, %v973_v36  ;;  %v999_v44 = vrot.slane %v970_v42, %v998_v39  ;;  %v2804_v17 = vrot.slane %v970_v42, %v982_v6 }
 0x990   :  { %2264 = vmatprep.subr.bf16.mxu1 %v2263_v38  ;;  %v995_v38 = vrot.slane %v970_v42, %v994_v61  ;;  %v1003_v45 = vrot.slane %v970_v42, %v1002_v41 }
 0x991   :  { %v991_v43 = vrot.slane %v970_v42, %v990_v37 }
 0x992   :  { %2298 = vmatpush3.bf16.msra.mxu0 %v2297_v53 }
 0x993   :  { %2266 = vmatpush3.bf16.msra.mxu1 %v2265_v50  ;;  %2300 = vmatprep.subr.bf16.mxu0 %v2299_v63 }
 0x994   :  { %2268 = vmatprep.subr.bf16.mxu1 %v2267_v57 }
 0x996   :  { %2302 = vmatpush3.bf16.msra.mxu0 %v2301_v5 }
 0x997   :  { %2270 = vmatpush3.bf16.msra.mxu1 %v2269_v2  ;;  %2304 = vmatprep.subr.bf16.mxu0 %v2303_v10  ;;  %v978_v10 = vsub.s32 1, %v973_v36 }
 0x998   :  { %2272 = vmatprep.subr.bf16.mxu1 %v2271_v7 }
 0x99a   :  { %2306 = vmatpush3.bf16.msra.mxu0 %v2305_v14  ;;  %v2800_v14 = vrot.slane %v970_v42, %v974_v3 }
 0x99b   :  { %2274 = vmatpush3.bf16.msra.mxu1 %v2273_v11  ;;  %2308 = vmatprep.subr.bf16.mxu0 %v2307_v24  ;;  %v986_v11 = vsub.s32 3, %v973_v36 }
 0x99c   :  { %2276 = vmatprep.subr.bf16.mxu1 %v2275_v18 }
 0x99d   :  { %v2815_v26 = vrot.slane %v970_v42, %v986_v11 }
 0x99e   :  { %2310 = vmatpush3.bf16.msra.mxu0 %v2309_v28 }
 0x99f   :  { %2278 = vmatpush3.bf16.msra.mxu1 %v2277_v25  ;;  %v2813_v25 = vrot.slane %v970_v42, %v978_v10 }
 0xa33   :  { %v2760_v29 = vpop.f32.mrb[8].mxu1  ;;  %v2762_v30 = vpop.f32.mrb[4].mxu0 }
 0xa34   :  { %v2764_v31 = vpop.f32.mrb[9].mxu1  ;;  %v2766_v32 = vpop.f32.mrb[5].mxu0  ;;  %v2822_v62 = vadd.f32 %v2760_v29, %v2800_v14  ;;  %v2829_v39 = vadd.f32 %v2762_v30, %v2804_v17 }
 0xa37   :  { %v2768_v1 = vpop.f32.mrb[10].mxu1  ;;  %v2770_v33 = vpop.f32.mrb[6].mxu0 }
 0xa38   :  { %v2772_v34 = vpop.f32.mrb[11].mxu1  ;;  %v2774_v0 = vpop.f32.mrb[7].mxu0 }
 0xa53   :  { %v1232_v46 = vpop.f32.mrb[12].mxu1  ;;  %v1309_v47 = vpop.f32.mrb[8].mxu0 }
 0xa54   :  { %v1233_v49 = vadd.f32 %v1232_v46, %v991_v43  ;;  %v2779_v50 = vadd.f32 %v1309_v47, %v999_v44  ;;  %v1234_v51 = vpop.f32.mrb[13].mxu1  ;;  %v1311_v52 = vpop.f32.mrb[9].mxu0 }
 0xa55   :  { %v2781_v53 = vadd.f32 %v1234_v51, %v995_v38  ;;  %v2783_v54 = vadd.f32 %v1311_v52, %v1003_v45 }
 0xa56   :  { %v2785_v55 = vmul.f32 0.70710677, %v1233_v49  ;;  %v2788_v56 = vmul.f32 0.70710677, %v2779_v50  ;;  %v2840_v30 = vmul.f32 0.5, %v1233_v49 }
 0xa57   :  { %v2791_v57 = vmul.f32 0.70710677, %v2781_v53  ;;  %v2794_v58 = vmul.f32 0.70710677, %v2783_v54  ;;  %v1238_v48 = vpop.f32.mrb[14].mxu1  ;;  %v1315_v9 = vpop.f32.mrb[10].mxu0 }
 0xa58   :  { %v1336_v59 = vand.u32 2147483647, %v2785_v55  ;;  %v1338_v60 = vand.u32 2147483647, %v2788_v56  ;;  %v1240_v12 = vpop.f32.mrb[15].mxu1  ;;  %v1317_v13 = vpop.f32.mrb[11].mxu0  ;;  %v2802_v16 = vadd.f32 %v1238_v48, %v991_v43  ;;  %v2806_v18 = vadd.f32 %v1315_v9, %v999_v44 }
 0xa59   :  { %v1337_v63 = vand.u32 2147483647, %v2791_v57  ;;  %v1339_v2 = vand.u32 2147483647, %v2794_v58  ;;  %v2811_v24 = vadd.f32 %v1240_v12, %v995_v38  ;;  %v2825_v37 = vadd.f32 %v1317_v13, %v1003_v45 }
 0xa5a   :  { %v1344_v4 = vmul.f32 0.3275911, %v1336_v59  ;;  %v1346_v5 = vmul.f32 0.3275911, %v1338_v60  ;;  %v1448_v19 = vsub.f32 0.0, %v1336_v59  ;;  %v1450_v27 = vsub.f32 0.0, %v1338_v60 }
 0xa5b   :  { %v1345_v35 = vmul.f32 0.3275911, %v1337_v63  ;;  %v1347_v8 = vmul.f32 0.3275911, %v1339_v2  ;;  %v2809_v23 = vmul.f32 0.70710677, %v2802_v16  ;;  %v2837_v38 = vadd.f32 %v2764_v31, %v2813_v25 }
 0xa5c   :  { %v1352_v40 = vadd.f32 1.0, %v1344_v4  ;;  %v1354_v7 = vadd.f32 1.0, %v1346_v5  ;;  %v2818_v28 = vmul.f32 0.70710677, %v2806_v18  ;;  %v1449_v61 = vsub.f32 0.0, %v1337_v63 }
 0xa5d   :  { %v1353_v15 = vadd.f32 1.0, %v1345_v35  ;;  %v1355_v21 = vadd.f32 1.0, %v1347_v8  ;;  %v1340_v36 = vand.u32 2147483647, %v2809_v23  ;;  %v2833_v42 = vmul.f32 0.70710677, %v2811_v24 }
 0xa5e   :  { %2376 = vrcp.f32 %v1352_v40  ;;  %v1342_v41 = vand.u32 2147483647, %v2818_v28  ;;  %v1456_v43 = vmul.f32 %v1448_v19, %v1336_v59  ;;  %v1451_v44 = vsub.f32 0.0, %v1339_v2 }
 0xa5f   :  { %2378 = vrcp.f32 %v1354_v7  ;;  %v1348_v29 = vmul.f32 0.3275911, %v1340_v36  ;;  %v1458_v45 = vmul.f32 %v1450_v27, %v1338_v60  ;;  %v1341_v47 = vand.u32 2147483647, %v2833_v42 }
 0xa60   :  { %2380 = vrcp.f32 %v1353_v15  ;;  %v1350_v46 = vmul.f32 0.3275911, %v1342_v41  ;;  %v1452_v52 = vsub.f32 0.0, %v1340_v36  ;;  %v2843_v3 = vmul.f32 0.70710677, %v2825_v37 }
 0xa61   :  { %2382 = vrcp.f32 %v1355_v21  ;;  %v1356_v51 = vadd.f32 1.0, %v1348_v29  ;;  %v1457_v4 = vmul.f32 %v1449_v61, %v1337_v63  ;;  %v1454_v5 = vsub.f32 0.0, %v1342_v41 }
 0xa62   :  { %v1358_v59 = vadd.f32 1.0, %v1350_v46  ;;  %v1349_v6 = vmul.f32 0.3275911, %v1341_v47  ;;  %v1464_v40 = vmul.f32 1.442695, %v1456_v43  ;;  %v1459_v31 = vmul.f32 %v1451_v44, %v1339_v2 }
 0xa63   :  { %2384 = vrcp.f32 %v1356_v51  ;;  %v1343_v60 = vand.u32 2147483647, %v2843_v3  ;;  %v1468_v8 = vmul.f32 1.442695, %v1458_v45  ;;  %v1460_v63 = vmul.f32 %v1452_v52, %v1340_v36 }
 0xa64   :  { %2386 = vrcp.f32 %v1358_v59  ;;  %v1357_v48 = vadd.f32 1.0, %v1349_v6  ;;  %v1453_v10 = vsub.f32 0.0, %v1341_v47  ;;  %v2853_v13 = vmul.f32 0.5, %v2779_v50 }
 0xa65   :  { %v1351_v11 = vmul.f32 0.3275911, %v1343_v60  ;;  %v1466_v2 = vmul.f32 1.442695, %v1457_v4  ;;  %v1462_v15 = vmul.f32 %v1454_v5, %v1342_v41  ;;  %v1455_v61 = vsub.f32 0.0, %v1343_v60 }
 0xa66   :  { %2388 = vrcp.f32 %v1357_v48  ;;  %v1470_v36 = vmul.f32 1.442695, %v1459_v31  ;;  %v1472_v50 = vmul.f32 1.442695, %v1460_v63  ;;  %v1461_v46 = vmul.f32 %v1453_v10, %v1341_v47 }
 0xa67   :  { %v1359_v27 = vadd.f32 1.0, %v1351_v11  ;;  %2390 = vpow2.f32 %v1464_v40  ;;  %v1476_v59 = vmul.f32 1.442695, %v1462_v15  ;;  %v1463_v5 = vmul.f32 %v1455_v61, %v1343_v60 }
 0xa68   :  { %v2845_v35 = vpop.eup %2376  ;;  %2392 = vpow2.f32 %v1468_v8  ;;  %v2869_v47 = vmul.f32 0.5, %v2781_v53  ;;  %v1474_v48 = vmul.f32 1.442695, %v1461_v46  ;;  %vm1496_vm2 = vcmp.ge.f32.partialorder %v2785_v55, 0.0 }
 0xa69   :  { %v2848_v7 = vpop.eup %2378  ;;  %v1376_v49 = vmul.f32 1.0614054, %v2845_v35  ;;  %2394 = vrcp.f32 %v1359_v27  ;;  %v1478_v15 = vmul.f32 1.442695, %v1463_v5  ;;  %vm1498_vm3 = vcmp.ge.f32.partialorder %v2788_v56, 0.0 }
 0xa6a   :  { %v1378_v9 = vmul.f32 1.0614054, %v2848_v7  ;;  %v2855_v19 = vpop.eup %2380  ;;  %2396 = vpow2.f32 %v1466_v2  ;;  %vm1497_vm4 = vcmp.ge.f32.partialorder %v2791_v57, 0.0  ;;  %vm1499_vm5 = vcmp.ge.f32.partialorder %v2794_v58, 0.0 }
 0xa6b   :  { %v1384_v12 = vadd.f32 -1.4531521, %v1376_v49  ;;  %v1377_v44 = vmul.f32 1.0614054, %v2855_v19  ;;  %v2859_v29 = vpop.eup %2382  ;;  %2398 = vpow2.f32 %v1470_v36  ;;  %v2882_v36 = vmul.f32 0.5, %v2783_v54 }
 0xa6c   :  { %v1386_v21 = vadd.f32 -1.4531521, %v1378_v9  ;;  %v1379_v52 = vmul.f32 1.0614054, %v2859_v29  ;;  %2400 = vpow2.f32 %v1472_v50  ;;  %vm1500_vm6 = vcmp.ge.f32.partialorder %v2809_v23, 0.0 }
 0xa6d   :  { %v1392_v43 = vmul.f32 %v2845_v35, %v1384_v12  ;;  %v1385_v51 = vadd.f32 -1.4531521, %v1377_v44  ;;  %v2865_v49 = vpop.eup %2384  ;;  %2402 = vpow2.f32 %v1476_v59  ;;  %vm1502_vm7 = vcmp.ge.f32.partialorder %v2818_v28, 0.0 }
 0xa6e   :  { %v1394_v45 = vmul.f32 %v2848_v7, %v1386_v21  ;;  %v1387_v31 = vadd.f32 -1.4531521, %v1379_v52  ;;  %v2871_v9 = vpop.eup %2386  ;;  %v1380_v11 = vmul.f32 1.0614054, %v2865_v49  ;;  %2404 = vpow2.f32 %v1474_v48 }
 0xa6f   :  { %v1400_v41 = vadd.f32 1.4214138, %v1392_v43  ;;  %v1393_v40 = vmul.f32 %v2855_v19, %v1385_v51  ;;  %v1382_v2 = vmul.f32 1.0614054, %v2871_v9  ;;  %2406 = vpow2.f32 %v1478_v15 }
 0xa70   :  { %v1402_v4 = vadd.f32 1.4214138, %v1394_v45  ;;  %v1395_v60 = vmul.f32 %v2859_v29, %v1387_v31  ;;  %v1388_v61 = vadd.f32 -1.4531521, %v1380_v11  ;;  %v2878_v43 = vpop.eup %2388  ;;  %v1162_v28 = vadd.f32 %v2770_v33, %v2804_v17 }
 0xa71   :  { %v1408_v6 = vmul.f32 %v2845_v35, %v1400_v41  ;;  %v1401_v10 = vadd.f32 1.4214138, %v1393_v40  ;;  %v1390_v45 = vadd.f32 -1.4531521, %v1382_v2  ;;  %v2391_v50 = vpop.eup %2390  ;;  %vm1501_vm8 = vcmp.ge.f32.partialorder %v2833_v42, 0.0 }
 0xa72   :  { %v1410_v8 = vmul.f32 %v2848_v7, %v1402_v4  ;;  %v1403_v27 = vadd.f32 1.4214138, %v1395_v60  ;;  %v1396_v52 = vmul.f32 %v2865_v49, %v1388_v61  ;;  %v2393_v4 = vpop.eup %2392  ;;  %vm1503_vm9 = vcmp.ge.f32.partialorder %v2843_v3, 0.0 }
 0xa73   :  { %v1416_v63 = vadd.f32 -0.28449672, %v1408_v6  ;;  %v1409_v53 = vmul.f32 %v2855_v19, %v1401_v10  ;;  %v1398_v5 = vmul.f32 %v2871_v9, %v1390_v45  ;;  %v1381_v6 = vmul.f32 1.0614054, %v2878_v43  ;;  %v2889_v54 = vpop.eup %2394 }
 0xa74   :  { %v1418_v12 = vadd.f32 -0.28449672, %v1410_v8  ;;  %v1411_v51 = vmul.f32 %v2859_v29, %v1403_v27  ;;  %v1404_v48 = vadd.f32 1.4214138, %v1396_v52  ;;  %v1327_v42 = vmul.f32 0.5, %v2825_v37 }
 0xa75   :  { %v1424_v21 = vmul.f32 %v2845_v35, %v1416_v63  ;;  %v1417_v41 = vadd.f32 -0.28449672, %v1409_v53  ;;  %v2397_v63 = vpop.eup %2396  ;;  %v1406_v60 = vadd.f32 1.4214138, %v1398_v5  ;;  %v1389_v11 = vadd.f32 -1.4531521, %v1381_v6 }
 0xa76   :  { %v1426_v44 = vmul.f32 %v2848_v7, %v1418_v12  ;;  %v1419_v8 = vadd.f32 -0.28449672, %v1411_v51  ;;  %v1383_v12 = vmul.f32 1.0614054, %v2889_v54  ;;  %v2399_v2 = vpop.eup %2398 }
 0xa77   :  { %v1432_v46 = vadd.f32 0.2548296, %v1424_v21  ;;  %v1425_v31 = vmul.f32 %v2855_v19, %v1417_v41  ;;  %v2401_v27 = vpop.eup %2400  ;;  %v1397_v45 = vmul.f32 %v2878_v43, %v1389_v11 }
 0xa78   :  { %v1434_v59 = vadd.f32 0.2548296, %v1426_v44  ;;  %v1427_v53 = vmul.f32 %v2859_v29, %v1419_v8  ;;  %v1414_v44 = vmul.f32 %v2871_v9, %v1406_v60 }
 0xa79   :  { %v1440_v40 = vmul.f32 %v2845_v35, %v1432_v46  ;;  %v1433_v15 = vadd.f32 0.2548296, %v1425_v31  ;;  %v1412_v35 = vmul.f32 %v2865_v49, %v1404_v48  ;;  %v1405_v6 = vadd.f32 1.4214138, %v1397_v45 }
 0xa7a   :  { %v1442_v10 = vmul.f32 %v2848_v7, %v1434_v59  ;;  %v1391_v7 = vadd.f32 -1.4531521, %v1383_v12  ;;  %v1435_v51 = vadd.f32 0.2548296, %v1427_v53  ;;  %v1422_v5 = vadd.f32 -0.28449672, %v1414_v44 }
 0xa7b   :  { %v1480_v21 = vmul.f32 %v2391_v50, %v1440_v40  ;;  %v1441_v41 = vmul.f32 %v2855_v19, %v1433_v15  ;;  %v1420_v52 = vadd.f32 -0.28449672, %v1412_v35  ;;  %v2403_v50 = vpop.eup %2402  ;;  %v1413_v11 = vmul.f32 %v2878_v43, %v1405_v6 }
 0xa7c   :  { %v1482_v61 = vmul.f32 %v2393_v4, %v1442_v10  ;;  %v1399_v4 = vmul.f32 %v2889_v54, %v1391_v7  ;;  %v1443_v8 = vmul.f32 %v2859_v29, %v1435_v51  ;;  %v2405_v10 = vpop.eup %2404  ;;  %v1430_v19 = vmul.f32 %v2871_v9, %v1422_v5 }
 0xa7d   :  { %v1488_v46 = vsub.f32 1.0, %v1480_v21  ;;  %v1481_v31 = vmul.f32 %v2397_v63, %v1441_v41  ;;  %v1428_v48 = vmul.f32 %v2865_v49, %v1420_v52  ;;  %v1421_v45 = vadd.f32 -0.28449672, %v1413_v11 }
 0xa7e   :  { %v1490_v59 = vsub.f32 1.0, %v1482_v61  ;;  %v1407_v12 = vadd.f32 1.4214138, %v1399_v4  ;;  %v1483_v53 = vmul.f32 %v2399_v2, %v1443_v8  ;;  %v2407_v61 = vpop.eup %2406  ;;  %v1438_v63 = vadd.f32 0.2548296, %v1430_v19 }
 0xa7f   :  { %v1504_v40 = vsub.f32 0.0, %v1488_v46  ;;  %v1489_v15 = vsub.f32 1.0, %v1481_v31  ;;  %v1436_v35 = vadd.f32 0.2548296, %v1428_v48 }
 0xa80   :  { %v1506_v60 = vsub.f32 0.0, %v1490_v59  ;;  %v1491_v51 = vsub.f32 1.0, %v1483_v53  ;;  %v1446_v55 = vmul.f32 %v2871_v9, %v1438_v63  ;;  %v1415_v2 = vmul.f32 %v2889_v54, %v1407_v12 }
 0xa81   :  { %v1512_v21 = vsel %vm1496_vm2, %v1488_v46, %v1504_v40  ;;  %v1505_v41 = vsub.f32 0.0, %v1489_v15  ;;  %v1444_v52 = vmul.f32 %v2865_v49, %v1436_v35  ;;  %v1429_v46 = vmul.f32 %v2878_v43, %v1421_v45 }
 0xa82   :  { %v1520_v44 = vadd.f32 1.0, %v1512_v21  ;;  %v1514_v29 = vsel %vm1498_vm3, %v1490_v59, %v1506_v60  ;;  %v1507_v59 = vsub.f32 0.0, %v1491_v51  ;;  %v1486_v8 = vmul.f32 %v2403_v50, %v1446_v55 }
 0xa83   :  { %v1522_v7 = vadd.f32 1.0, %v1514_v29  ;;  %v1513_v56 = vsel %vm1497_vm4, %v1489_v15, %v1505_v41  ;;  %v1484_v4 = vmul.f32 %v2401_v27, %v1444_v52  ;;  %v1437_v49 = vadd.f32 0.2548296, %v1429_v46 }
 0xa84   :  { %v1528_v5 = vmul.f32 %v1520_v44, %v2840_v30  ;;  %v1521_v31 = vadd.f32 1.0, %v1513_v56  ;;  %v1515_v9 = vsel %vm1499_vm5, %v1491_v51, %v1507_v59  ;;  %v1423_v60 = vadd.f32 -0.28449672, %v1415_v2 }
 0xa85   :  { %v1530_v6 = vmul.f32 %v1522_v7, %v2853_v13  ;;  %v1492_v48 = vsub.f32 1.0, %v1484_v4  ;;  %v1523_v13 = vadd.f32 1.0, %v1515_v9  ;;  %v1494_v11 = vsub.f32 1.0, %v1486_v8 }
 0xa86   :  { %v1536_v40 = vmul.f32 %v1528_v5, %v2822_v62  ;;  %v1529_v19 = vmul.f32 %v1521_v31, %v2869_v47  ;;  %v1445_v57 = vmul.f32 %v2878_v43, %v1437_v49  ;;  %v1158_v27 = vadd.f32 %v2766_v32, %v2815_v26 }
 0xa87   :  { %v1538_v30 = vmul.f32 %v1530_v6, %v2829_v39  ;;  %v1508_v62 = vsub.f32 0.0, %v1492_v48  ;;  %v1431_v50 = vmul.f32 %v2889_v54, %v1423_v60  ;;  %v1531_v39 = vmul.f32 %v1523_v13, %v2882_v36 }
 0xa88   :  { %v1510_v58 = vsub.f32 0.0, %v1494_v11  ;;  %v1485_v12 = vmul.f32 %v2405_v10, %v1445_v57  ;;  %v1537_v21 = vmul.f32 %v1529_v19, %v2837_v38  ;;  %v1324_v47 = vmul.f32 0.5, %v2802_v16 }
 0xa89   :  { %v1516_v15 = vsel %vm1500_vm6, %v1492_v48, %v1508_v62  ;;  %v1439_v43 = vadd.f32 0.2548296, %v1431_v50  ;;  %v1539_v23 = vmul.f32 %v1531_v39, %v1158_v27  ;;  %v1326_v44 = vmul.f32 0.5, %v2806_v18 }
 0xa8a   :  { %v1524_v53 = vadd.f32 1.0, %v1516_v15  ;;  %v1518_v35 = vsel %vm1502_vm7, %v1494_v11, %v1510_v58  ;;  %v1493_v32 = vsub.f32 1.0, %v1485_v12  ;;  %1679 = vmatprep.mubr.f32.mxu1 %v1537_v21  ;;  %v1085_v38 = vadd.f32 %v2768_v1, %v2800_v14 }
 0xa8b   :  { %v1526_v29 = vadd.f32 1.0, %v1518_v35  ;;  %v1447_v36 = vmul.f32 %v2889_v54, %v1439_v43  ;;  %1680 = vmatmul.mubr.f32.vlgmr.msra.gmra.mrb[16].mxu1 %v1536_v40  ;;  %1754 = vmatprep.mubr.f32.mxu0 %v1539_v23  ;;  %v1325_v41 = vmul.f32 0.5, %v2811_v24  ;;  %v1087_v1 = vadd.f32 %v2772_v34, %v2813_v25  ;;  %v1799_v34 = vld [vmem:[%s2966_s7] ss:$0 sm:$0xff] }
 0xa8c   :  { %v1532_v10 = vmul.f32 %v1524_v53, %v1324_v47  ;;  %v1509_v16 = vsub.f32 0.0, %v1493_v32  ;;  %1755 = vmatmul.mubr.f32.vlgmr.msra.gmra.mrb[12].mxu0 %v1538_v30  ;;  %v1164_v55 = vadd.f32 %v2774_v0, %v2815_v26 }
 0xa8d   :  { %v1534_v63 = vmul.f32 %v1526_v29, %v1326_v44  ;;  %v1487_v45 = vmul.f32 %v2407_v61, %v1447_v36 }
 0xa8e   :  { %v1517_v7 = vsel %vm1501_vm8, %v1493_v32, %v1509_v16  ;;  %v1540_v18 = vmul.f32 %v1532_v10, %v1085_v38 }
 0xa8f   :  { %v1525_v54 = vadd.f32 1.0, %v1517_v7  ;;  %v1495_v51 = vsub.f32 1.0, %v1487_v45  ;;  %v1542_v52 = vmul.f32 %v1534_v63, %v1162_v28 }
 0xa91   :  { %v1533_v14 = vmul.f32 %v1525_v54, %v1325_v41  ;;  %v1511_v5 = vsub.f32 0.0, %v1495_v51 }
 0xa93   :  { %v1519_v33 = vsel %vm1503_vm9, %v1495_v51, %v1511_v5  ;;  %v1541_v17 = vmul.f32 %v1533_v14, %v1087_v1 }
 0xa94   :  { %v1527_v61 = vadd.f32 1.0, %v1519_v33 }
 0xa95   :  { %1684 = vmatprep.mubr.f32.mxu1 %v1541_v17 }
 0xa96   :  { %v1535_v24 = vmul.f32 %v1527_v61, %v1327_v42  ;;  %1685 = vmatmul.mubr.f32.gmra.mrb[18].mxu1 %v1540_v18 }
 0xa98   :  { %v1543_v46 = vmul.f32 %v1535_v24, %v1164_v55 }
 0xa9a   :  { %1759 = vmatprep.mubr.f32.mxu0 %v1543_v46 }
 0xa9b   :  { %1760 = vmatmul.mubr.f32.gmra.mrb[14].mxu0 %v1542_v52 }
 0xb5e   :  { %v1886_v2 = vpop.f32.mrb[16].mxu1 }
 0xb5f   :  { %v1887_v25 = vpop.f32.mrb[17].mxu1  ;;  %v1924_v3 = vpop.f32.mrb[12].mxu0 }
 0xb60   :  { %v1888_v6 = vadd.f32 %v1887_v25, %v1886_v2  ;;  %v1925_v56 = vpop.f32.mrb[13].mxu0 }
 0xb61   :  { %v1926_v59 = vadd.f32 %v1925_v56, %v1924_v3 }
 0xb62   :  { %v1682_v37 = vadd.f32 %v1888_v6, %v1799_v34 }
 0xb64   :  { %v1757_v4 = vadd.f32 %v1926_v59, %v1682_v37 }
 0xb66   :  { %v1765_v40 = vadd.f32 %v1757_v4, %v2718_v22 }
 0xb68   :  { %1767 = vst [vmem:[%s2971_s12] sm:$0xff] %v1765_v40 }
 0xb69   :  { %v1889_v0 = vpop.f32.mrb[18].mxu1 }
 0xb6a   :  { %v1890_v26 = vpop.f32.mrb[19].mxu1 }
 0xb6b   :  { %v1891_v31 = vadd.f32 %v1890_v26, %v1889_v0 }
 0xb6d   :  { %v1687_v49 = vadd.f32 %v1891_v31, %v1799_v34 }
 0xb6e   :  { %v1927_v8 = vpop.f32.mrb[14].mxu0 }
 0xb6f   :  { %v1928_v30 = vpop.f32.mrb[15].mxu0 }
 0xb70   :  { %v1929_v9 = vadd.f32 %v1928_v30, %v1927_v8 }
 0xb72   :  { %v1762_v48 = vadd.f32 %v1929_v9, %v1687_v49 }
 0xb74   :  { %v1766_v60 = vadd.f32 %v1762_v48, %v2715_v20 }
 0xb76   :  { %1768 = vst [vmem:[%s2971_s12 + $0x8] sm:$0xff] %v1766_v60 }
 0xb77   :  { %1773 = vsyncpa [#allocation3], 1 }
 0xb78   :  { %1774 = vsyncpa [#allocation5], 1 }

</bundles_post_ra>
